<compile_context>
chip_gen: v6e
topology: v6e:2x2x1
jax: 0.10.0
libtpu: 0.0.40
codegen_flags: <defaults>
</compile_context>

<pallas_src>
import numpy as np
import jax
import jax.numpy as jnp
from jax.experimental import pallas as pl
from jax.experimental.pallas import tpu as pltpu

F32 = jnp.float32
BN_EPS = 1e-5


# --------------------------------------------------------------------------- #
# Fused layer kernel: BlockGC + temporal conv + BN + residuals + ReLU
# --------------------------------------------------------------------------- #
def _make_fused_layer_kernel(kt, stride, dilation, pad, t_in, t_out, res_mode):
    """One sample per grid step.  Layout: rows = time, cols = V*C (lane-dense).

    res_mode: "none"    -> relu(tcn(gcn(x)))
              "add"     -> relu(tcn(gcn(x)) + x)              (identity residual)
              "project" -> relu(tcn(gcn(x)) + bn(W_l @ x))    (1x1-conv residual)
    """

    def kernel(*refs):
        if res_mode == "project":
            (xp_ref, op_ref, gsh_ref, wt_ref, tsh_ref,
             wl_ref, lsh_ref, o_ref, g_scr) = refs
        else:
            xp_ref, op_ref, gsh_ref, wt_ref, tsh_ref, o_ref, g_scr = refs

        # ---- BlockGC: vertex mix + grouped 1x1 + K-sum + BN + gres + ReLU,
        #      folded into one lane-dense matmul (contraction = V*C_in).
        xg = xp_ref[0]                                        # (T, V*C_in)
        g = jnp.dot(xg, op_ref[...], preferred_element_type=jnp.float32)
        g = jnp.maximum(g + gsh_ref[...], 0.0)                # (T, V*C_out)

        # ---- Zero-pad along T inside VMEM (no HBM pad round trip).
        g_scr[...] = jnp.zeros_like(g_scr)
        g_scr[pl.ds(pad, t_in), :] = g

        # ---- Temporal conv: per-tap accumulation of lane-dense matmuls.
        vc_out = o_ref.shape[2]
        y = jnp.zeros((t_out, vc_out), dtype=jnp.float32)
        for dt in range(kt):
            start = dt * dilation
            if stride == 1:
                tap = g_scr[pl.ds(start, t_out), :]
            else:
                tap = g_scr[pl.ds(start, t_out, stride=stride), :]
            y = y + jnp.dot(tap, wt_ref[dt], preferred_element_type=jnp.float32)
        y = y + tsh_ref[...]                                  # conv bias + BN folded

        # ---- Layer residual: xp tile is already in VMEM, no second HBM read.
        if res_mode == "add":
            y = y + xg.astype(jnp.float32)
        elif res_mode == "project":
            if stride == 1:
                xr = xg
            else:
                xr = xp_ref[0, pl.ds(0, t_out, stride=stride), :]
            y = (y + jnp.dot(xr, wl_ref[...], preferred_element_type=jnp.float32)
                 + lsh_ref[...])

        o_ref[0] = jnp.maximum(y, 0.0).astype(o_ref.dtype)    # lane-dense store

    return kernel


# --------------------------------------------------------------------------- #
# Parameter folding (plain JAX, hoisted out of the forward — done once)
# --------------------------------------------------------------------------- #
def _bn_scale_shift(bn):
    scale = bn["gamma"] / jnp.sqrt(bn["var"] + BN_EPS)
    shift = bn["beta"] - bn["mean"] * scale
    return scale, shift


def fold_layer_params(p, hop, cfg, c_in, v):
    """Fold every static parameter of the layer into kernel-ready constants.

    BlockGC row index = v*C_in + c (channels-last flatten), col = w*C_out + o.
    """
    c_out = cfg["out_channels"]
    H = cfg["H"]
    kt, stride, dil = cfg["t_kernel"], cfg["stride"], cfg["dilation"]

    # --- D_TopoProjector: linear + BN folded into one affine map.
    s_p, sh_p = _bn_scale_shift(p["proj_bn"])
    proj_wt = (p["proj_w"] * s_p[:, None]).T                   # (in_dim, C_in)
    proj_sh = p["proj_b"] * s_p + sh_p                         # (C_in,)

    # --- BlockGC fused operator (vertex mixing, grouped 1x1, K-sum, BN, gres).
    B = p["emb_table"][:, :, hop]                              # (K, H, V, V)
    A = p["A"]

    def l2(w):
        return jnp.sqrt(jnp.sum(w * w, axis=-2, keepdims=True)) + 1e-4

    BnA = B / l2(B) + A / l2(A)                                # (K, H, V, V)
    Ph = jnp.einsum("khvw,khoc->hvcwo", BnA, p["block_w"])     # (H,V,cg_in,V,cg_out)
    full = jnp.einsum("hvcwo,hg->vhcwgo", Ph, jnp.eye(H, dtype=F32))
    full = full.reshape(v * c_in, v * c_out)

    s_g, sh_g = _bn_scale_shift(p["gcn_bn"])
    bsum = p["block_b"].sum(0).reshape(c_out)                  # conv bias, K-summed
    gsh = sh_g + s_g * bsum
    op = full * jnp.tile(s_g, v)[None, :]

    if c_in != c_out:
        # BlockGC residual = BN(1x1 conv): fold as kron(I_V, Wg*scale).
        s_r, sh_r = _bn_scale_shift(p["gres_bn"])
        wg = p["gres_w"][:, :, 0] * s_r[:, None]               # (C_out, C_in)
        op = op + jnp.einsum("oc,vw->vcwo", wg,
                             jnp.eye(v, dtype=F32)).reshape(v * c_in, v * c_out)
        gsh = gsh + sh_r + s_r * p["gres_b"]
    else:
        op = op + jnp.eye(v * c_in, dtype=F32)                 # identity residual
    gsh = jnp.tile(gsh, v).reshape(1, v * c_out)

    # --- Temporal conv: per-tap vertex-block-diagonal weights with BN folded.
    s_t, sh_t = _bn_scale_shift(p["tcn_bn"])
    eyev = jnp.eye(v, dtype=F32)
    wt = jnp.stack(
        [jnp.einsum("oc,wu->wcuo", p["tcn_w"][:, :, dt] * s_t[:, None], eyev
                    ).reshape(v * c_out, v * c_out) for dt in range(kt)],
        axis=0)                                                # (kt, VC_out, VC_out)
    tsh = jnp.tile(sh_t + s_t * p["tcn_b"], v).reshape(1, v * c_out)

    # --- Layer residual.
    if not cfg["residual"]:
        res_mode, wl, lsh = "none", None, None
    elif c_in == c_out and stride == 1:
        res_mode, wl, lsh = "add", None, None
    else:
        res_mode = "project"
        s_l, sh_l = _bn_scale_shift(p["lres_bn"])
        wls = p["lres_w"][:, :, 0] * s_l[:, None]              # (C_out, C_in)
        wl = jnp.einsum("oc,vw->vcwo", wls, eyev).reshape(v * c_in, v * c_out)
        lsh = jnp.tile(sh_l + s_l * p["lres_b"], v).reshape(1, v * c_out)

    return dict(proj_wt=proj_wt, proj_sh=proj_sh, op=op, gsh=gsh,
                wt=wt, tsh=tsh, res_mode=res_mode, wl=wl, lsh=lsh)


# --------------------------------------------------------------------------- #
# Layer forward
# --------------------------------------------------------------------------- #
def blockgcn_layer_forward(x, d_topo, consts, cfg):
    n, c_in, t, v = x.shape
    c_out = cfg["out_channels"]
    kt, stride, dil = cfg["t_kernel"], cfg["stride"], cfg["dilation"]
    pad = (kt - 1) * dil // 2
    t_pad = t + 2 * pad
    t_out = (t_pad - dil * (kt - 1) - 1) // stride + 1
    vc_in, vc_out = v * c_in, v * c_out

    # Topo projector + broadcast add + channels-last flatten: plain JAX so XLA
    # fuses it with the single NCHW -> (N, T, V*C_in) layout change.
    emb = jnp.maximum(d_topo @ consts["proj_wt"] + consts["proj_sh"], 0.0)   # (N, C_in)
    xp = jnp.transpose(x, (0, 2, 3, 1)) + emb[:, None, None, :]              # (N,T,V,C)
    xp = xp.reshape(n, t, vc_in)

    res_mode = consts["res_mode"]
    kernel = _make_fused_layer_kernel(kt, stride, dil, pad, t, t_out, res_mode)

    args = [xp, consts["op"], consts["gsh"], consts["wt"], consts["tsh"]]
    in_specs = [
        pl.BlockSpec((1, t, vc_in), lambda i: (i, 0, 0)),
        pl.BlockSpec((vc_in, vc_out), lambda i: (0, 0)),
        pl.BlockSpec((1, vc_out), lambda i: (0, 0)),
        pl.BlockSpec((kt, vc_out, vc_out), lambda i: (0, 0, 0)),
        pl.BlockSpec((1, vc_out), lambda i: (0, 0)),
    ]
    if res_mode == "project":
        args += [consts["wl"], consts["lsh"]]
        in_specs += [
            pl.BlockSpec((vc_in, vc_out), lambda i: (0, 0)),
            pl.BlockSpec((1, vc_out), lambda i: (0, 0)),
        ]

    out = pl.pallas_call(
        kernel,
        grid=(n,),
        in_specs=in_specs,
        out_specs=pl.BlockSpec((1, t_out, vc_out), lambda i: (i, 0, 0)),
        out_shape=jax.ShapeDtypeStruct((n, t_out, vc_out), x.dtype),
        scratch_shapes=[pltpu.VMEM((t_pad, vc_out), jnp.float32)],
        compiler_params=pltpu.CompilerParams(dimension_semantics=("parallel",)),
    )(*args)

    return jnp.transpose(out.reshape(n, t_out, v, c_out), (0, 3, 1, 2))


# --------------------------------------------------------------------------- #
# Pure-JAX reference (mirrors the PyTorch forward, inference-mode BN)
# --------------------------------------------------------------------------- #
def ref_bn(x, bn, axis=1):
    shape = [1] * x.ndim
    shape[axis] = -1
    return ((x - bn["mean"].reshape(shape)) / jnp.sqrt(bn["var"].reshape(shape) + BN_EPS)
            * bn["gamma"].reshape(shape) + bn["beta"].reshape(shape))


def ref_tconv(x, w, b, bn, kt, stride=1, dil=1):
    pad = (kt - 1) * dil // 2
    y = jax.lax.conv_general_dilated(
        x, w[:, :, :, None], window_strides=(stride, 1),
        padding=((pad, pad), (0, 0)), rhs_dilation=(dil, 1),
        dimension_numbers=("NCHW", "OIHW", "NCHW"))
    y = y + b[None, :, None, None]
    return ref_bn(y, bn, 1)


def ref_forward(x, d_topo, p, hop, cfg):
    n, c_in, t, v = x.shape
    c_out, H = cfg["out_channels"], cfg["H"]
    cg_in = c_in // H

    y = d_topo @ p["proj_w"].T + p["proj_b"]
    y = jnp.maximum(ref_bn(y, p["proj_bn"], 1), 0.0)
    xp = x + y[:, :, None, None]

    if not cfg["residual"]:
        res = 0.0
    elif c_in == c_out and cfg["stride"] == 1:
        res = xp
    else:
        res = ref_tconv(xp, p["lres_w"], p["lres_b"], p["lres_bn"], 1, cfg["stride"], 1)

    gres = xp if c_in == c_out else ref_tconv(xp, p["gres_w"], p["gres_b"], p["gres_bn"], 1)
    B = p["emb_table"][:, :, hop]
    A = p["A"]

    def l2(w):
        return jnp.sqrt(jnp.sum(w * w, axis=-2, keepdims=True)) + 1e-4

    BnA = B / l2(B) + A / l2(A)
    xr = xp.reshape(n, H, cg_in, t, v)
    yv = jnp.einsum("nhctv,khvw->nkhctw", xr, BnA)
    z = jnp.einsum("nkhctw,khoc->nkhotw", yv, p["block_w"])
    z = z + p["block_b"][None, :, :, :, None, None]
    z = z.sum(axis=1).reshape(n, c_out, t, v)
    z = ref_bn(z, p["gcn_bn"], 1)
    g = jnp.maximum(z + gres, 0.0)

    tc = ref_tconv(g, p["tcn_w"], p["tcn_b"], p["tcn_bn"],
                   cfg["t_kernel"], cfg["stride"], cfg["dilation"])
    return jnp.maximum(tc + res, 0.0)


# --------------------------------------------------------------------------- #
# Deterministic synthetic parameters
# --------------------------------------------------------------------------- #
def init_params(key, c_in, c_out, K, H, hop_max, V, t_kernel, in_dim=64):
    keys = jax.random.split(key, 64)
    it = iter(keys)

    def nrm(shape, s=0.1):
        return (s * jax.random.normal(next(it), shape, dtype=F32)).astype(F32)

    def bn(c):
        return dict(gamma=1.0 + nrm((c,), 0.1), beta=nrm((c,), 0.1),
                    mean=nrm((c,), 0.1),
                    var=1.0 + 0.1 * jnp.abs(jax.random.normal(next(it), (c,), F32)))

    cg_in, cg_out = c_in // H, c_out // H
    p = {}
    p["proj_w"] = nrm((c_in, in_dim), 0.2)
    p["proj_b"] = nrm((c_in,), 0.1)
    p["proj_bn"] = bn(c_in)
    # NOTE: emb_table is zero-init in the PyTorch module; random here to exercise the kernel.
    p["emb_table"] = nrm((K, H, hop_max + 1), 0.5)
    p["A"] = jnp.broadcast_to(jnp.eye(V, dtype=F32), (K, H, V, V)) + nrm((K, H, V, V), 0.05)
    p["block_w"] = nrm((K, H, cg_out, cg_in), 0.3)
    p["block_b"] = nrm((K, H, cg_out), 0.1)
    p["gcn_bn"] = bn(c_out)
    p["gres_w"] = nrm((c_out, c_in, 1), 0.2)
    p["gres_b"] = nrm((c_out,), 0.1)
    p["gres_bn"] = bn(c_out)
    p["lres_w"] = nrm((c_out, c_in, 1), 0.2)
    p["lres_b"] = nrm((c_out,), 0.1)
    p["lres_bn"] = bn(c_out)
    p["tcn_w"] = nrm((c_out, c_out, t_kernel), 0.1)
    p["tcn_b"] = nrm((c_out,), 0.1)
    p["tcn_bn"] = bn(c_out)
    return p


# --------------------------------------------------------------------------- #
if __name__ == "__main__":
    V = 8
    hop = np.minimum(np.abs(np.arange(V)[:, None] - np.arange(V)[None, :]), 3).astype(np.int32)
    base_key = jax.random.PRNGKey(0)

    def run_case(name, n, c_in, c_out, t, stride, residual, case_id):
        K, n_heads, t_kernel, dilation = 3, 8, 5, 1
        H = n_heads if c_in > n_heads else 1
        cfg = dict(out_channels=c_out, K=K, H=H, t_kernel=t_kernel,
                   stride=stride, dilation=dilation, residual=residual)
        key = jax.random.fold_in(base_key, case_id)
        kx, kd, kp = jax.random.split(key, 3)
        x = jax.random.normal(kx, (n, c_in, t, V), F32)
        d_topo = jax.random.normal(kd, (n, 64), F32)
        params = init_params(kp, c_in, c_out, K, H, int(hop.max()), V, t_kernel)

        consts = fold_layer_params(params, hop, cfg, c_in, V)   # hoisted: folded once
        out = jax.block_until_ready(blockgcn_layer_forward(x, d_topo, consts, cfg))
        ref = jax.block_until_ready(ref_forward(x, d_topo, params, hop, cfg))
        assert out.shape == ref.shape, (name, out.shape, ref.shape)
        if not np.allclose(np.asarray(out), np.asarray(ref), rtol=3e-2, atol=3e-2):
            raise AssertionError(
                f"{name}: mismatch, max abs err = {float(jnp.max(jnp.abs(out - ref)))}")

    # Exercises the 1x1-conv ("project") layer residual and the gres 1x1 fold.
    run_case("project_residual", 2, 16, 32, 16, 1, True, 0)
    # Exercises the identity layer residual and the identity gres fold.
    run_case("identity_residual", 2, 32, 32, 16, 1, True, 1)

    print("KERNEL_OK")
</pallas_src>

<mosaic_0001>
module attributes {stable_mosaic.version = 11 : i64} {
  func.func @kernel(%arg0: i32, %arg1: memref<1x16x128xf32, #tpu.memory_space<vmem>>, %arg2: memref<128x256xf32, #tpu.memory_space<vmem>>, %arg3: memref<1x256xf32, #tpu.memory_space<vmem>>, %arg4: memref<5x256x256xf32, #tpu.memory_space<vmem>>, %arg5: memref<1x256xf32, #tpu.memory_space<vmem>>, %arg6: memref<128x256xf32, #tpu.memory_space<vmem>>, %arg7: memref<1x256xf32, #tpu.memory_space<vmem>>, %arg8: memref<1x16x256xf32, #tpu.memory_space<vmem>>, %arg9: memref<20x256xf32, #tpu.memory_space<vmem>>) attributes {dimension_semantics = [#tpu.dimension_semantics<parallel>], iteration_bounds = array<i64: 2>, scalar_prefetch = 0 : i64, scratch_operands = 1 : i64, tpu.core_type = #tpu.core_type<tc>, window_params = [{transform_indices = @transform_0, window_bounds = array<i64: 1, 16, 128>}, {pipeline_mode = #tpu.pipeline_mode<synchronous>, transform_indices = @transform_1, window_bounds = array<i64: 128, 256>}, {pipeline_mode = #tpu.pipeline_mode<synchronous>, transform_indices = @transform_2, window_bounds = array<i64: 1, 256>}, {pipeline_mode = #tpu.pipeline_mode<synchronous>, transform_indices = @transform_3, window_bounds = array<i64: 5, 256, 256>}, {pipeline_mode = #tpu.pipeline_mode<synchronous>, transform_indices = @transform_4, window_bounds = array<i64: 1, 256>}, {pipeline_mode = #tpu.pipeline_mode<synchronous>, transform_indices = @transform_5, window_bounds = array<i64: 128, 256>}, {pipeline_mode = #tpu.pipeline_mode<synchronous>, transform_indices = @transform_6, window_bounds = array<i64: 1, 256>}, {transform_indices = @transform_7, window_bounds = array<i64: 1, 16, 256>}]} {
    %c0 = arith.constant 0 : index
    %c0_0 = arith.constant 0 : index
    %c0_1 = arith.constant 0 : index
    %0 = vector.load %arg1[%c0, %c0_0, %c0_1] : memref<1x16x128xf32, #tpu.memory_space<vmem>>, vector<1x16x128xf32>
    %1 = vector.shape_cast %0 : vector<1x16x128xf32> to vector<16x128xf32>
    %c0_2 = arith.constant 0 : index
    %c0_3 = arith.constant 0 : index
    %2 = vector.load %arg2[%c0_2, %c0_3] : memref<128x256xf32, #tpu.memory_space<vmem>>, vector<128x256xf32>
    %cst = arith.constant dense<0.000000e+00> : vector<16x256xf32>
    %3 = tpu.matmul %1, %2, %cst {dimension_numbers = #tpu.dot_dimension_numbers<[1], [0], [0], [1], [0, 0, 1, 1], [], []>} : vector<16x128xf32>, vector<128x256xf32>, vector<16x256xf32> -> vector<16x256xf32>
    %c0_4 = arith.constant 0 : index
    %c0_5 = arith.constant 0 : index
    %4 = vector.load %arg3[%c0_4, %c0_5] : memref<1x256xf32, #tpu.memory_space<vmem>>, vector<1x256xf32>
    %5 = vector.broadcast %4 : vector<1x256xf32> to vector<16x256xf32>
    %6 = arith.addf %3, %5 : vector<16x256xf32>
    %cst_6 = arith.constant 0.000000e+00 : f32
    %7 = vector.broadcast %cst_6 : f32 to vector<16x256xf32>
    %8 = arith.maximumf %6, %7 : vector<16x256xf32>
    %cst_7 = arith.constant 0.000000e+00 : f32
    %9 = vector.broadcast %cst_7 : f32 to vector<20x256xf32>
    %c0_8 = arith.constant 0 : index
    %c0_9 = arith.constant 0 : index
    %10 = vector.load %arg9[%c0_8, %c0_9] : memref<20x256xf32, #tpu.memory_space<vmem>>, vector<20x256xf32>
    tpu.vector_store %arg9[%c0_8, %c0_9], %9 {strides = array<i32>} : memref<20x256xf32, #tpu.memory_space<vmem>>, vector<20x256xf32>,
    %c2 = arith.constant 2 : index
    %c0_10 = arith.constant 0 : index
    %11 = vector.load %arg9[%c2, %c0_10] : memref<20x256xf32, #tpu.memory_space<vmem>>, vector<16x256xf32>
    tpu.vector_store %arg9[%c2, %c0_10], %8 {strides = array<i32>} : memref<20x256xf32, #tpu.memory_space<vmem>>, vector<16x256xf32>,
    %cst_11 = arith.constant 0.000000e+00 : f32
    %12 = vector.broadcast %cst_11 : f32 to vector<16x256xf32>
    %c0_12 = arith.constant 0 : index
    %c0_13 = arith.constant 0 : index
    %13 = vector.load %arg9[%c0_12, %c0_13] : memref<20x256xf32, #tpu.memory_space<vmem>>, vector<16x256xf32>
    %c0_14 = arith.constant 0 : index
    %c0_15 = arith.constant 0 : index
    %c0_16 = arith.constant 0 : index
    %14 = vector.load %arg4[%c0_14, %c0_15, %c0_16] : memref<5x256x256xf32, #tpu.memory_space<vmem>>, vector<1x256x256xf32>
    %15 = vector.shape_cast %14 : vector<1x256x256xf32> to vector<256x256xf32>
    %cst_17 = arith.constant dense<0.000000e+00> : vector<16x256xf32>
    %16 = tpu.matmul %13, %15, %cst_17 {dimension_numbers = #tpu.dot_dimension_numbers<[1], [0], [0], [1], [0, 0, 1, 1], [], []>} : vector<16x256xf32>, vector<256x256xf32>, vector<16x256xf32> -> vector<16x256xf32>
    %17 = arith.addf %12, %16 : vector<16x256xf32>
    %c1 = arith.constant 1 : index
    %c0_18 = arith.constant 0 : index
    %18 = vector.load %arg9[%c1, %c0_18] : memref<20x256xf32, #tpu.memory_space<vmem>>, vector<16x256xf32>
    %c1_19 = arith.constant 1 : index
    %c0_20 = arith.constant 0 : index
    %c0_21 = arith.constant 0 : index
    %19 = vector.load %arg4[%c1_19, %c0_20, %c0_21] : memref<5x256x256xf32, #tpu.memory_space<vmem>>, vector<1x256x256xf32>
    %20 = vector.shape_cast %19 : vector<1x256x256xf32> to vector<256x256xf32>
    %cst_22 = arith.constant dense<0.000000e+00> : vector<16x256xf32>
    %21 = tpu.matmul %18, %20, %cst_22 {dimension_numbers = #tpu.dot_dimension_numbers<[1], [0], [0], [1], [0, 0, 1, 1], [], []>} : vector<16x256xf32>, vector<256x256xf32>, vector<16x256xf32> -> vector<16x256xf32>
    %22 = arith.addf %17, %21 : vector<16x256xf32>
    %c2_23 = arith.constant 2 : index
    %c0_24 = arith.constant 0 : index
    %23 = vector.load %arg9[%c2_23, %c0_24] : memref<20x256xf32, #tpu.memory_space<vmem>>, vector<16x256xf32>
    %c2_25 = arith.constant 2 : index
    %c0_26 = arith.constant 0 : index
    %c0_27 = arith.constant 0 : index
    %24 = vector.load %arg4[%c2_25, %c0_26, %c0_27] : memref<5x256x256xf32, #tpu.memory_space<vmem>>, vector<1x256x256xf32>
    %25 = vector.shape_cast %24 : vector<1x256x256xf32> to vector<256x256xf32>
    %cst_28 = arith.constant dense<0.000000e+00> : vector<16x256xf32>
    %26 = tpu.matmul %23, %25, %cst_28 {dimension_numbers = #tpu.dot_dimension_numbers<[1], [0], [0], [1], [0, 0, 1, 1], [], []>} : vector<16x256xf32>, vector<256x256xf32>, vector<16x256xf32> -> vector<16x256xf32>
    %27 = arith.addf %22, %26 : vector<16x256xf32>
    %c3 = arith.constant 3 : index
    %c0_29 = arith.constant 0 : index
    %28 = vector.load %arg9[%c3, %c0_29] : memref<20x256xf32, #tpu.memory_space<vmem>>, vector<16x256xf32>
    %c3_30 = arith.constant 3 : index
    %c0_31 = arith.constant 0 : index
    %c0_32 = arith.constant 0 : index
    %29 = vector.load %arg4[%c3_30, %c0_31, %c0_32] : memref<5x256x256xf32, #tpu.memory_space<vmem>>, vector<1x256x256xf32>
    %30 = vector.shape_cast %29 : vector<1x256x256xf32> to vector<256x256xf32>
    %cst_33 = arith.constant dense<0.000000e+00> : vector<16x256xf32>
    %31 = tpu.matmul %28, %30, %cst_33 {dimension_numbers = #tpu.dot_dimension_numbers<[1], [0], [0], [1], [0, 0, 1, 1], [], []>} : vector<16x256xf32>, vector<256x256xf32>, vector<16x256xf32> -> vector<16x256xf32>
    %32 = arith.addf %27, %31 : vector<16x256xf32>
    %c4 = arith.constant 4 : index
    %c0_34 = arith.constant 0 : index
    %33 = vector.load %arg9[%c4, %c0_34] : memref<20x256xf32, #tpu.memory_space<vmem>>, vector<16x256xf32>
    %c4_35 = arith.constant 4 : index
    %c0_36 = arith.constant 0 : index
    %c0_37 = arith.constant 0 : index
    %34 = vector.load %arg4[%c4_35, %c0_36, %c0_37] : memref<5x256x256xf32, #tpu.memory_space<vmem>>, vector<1x256x256xf32>
    %35 = vector.shape_cast %34 : vector<1x256x256xf32> to vector<256x256xf32>
    %cst_38 = arith.constant dense<0.000000e+00> : vector<16x256xf32>
    %36 = tpu.matmul %33, %35, %cst_38 {dimension_numbers = #tpu.dot_dimension_numbers<[1], [0], [0], [1], [0, 0, 1, 1], [], []>} : vector<16x256xf32>, vector<256x256xf32>, vector<16x256xf32> -> vector<16x256xf32>
    %37 = arith.addf %32, %36 : vector<16x256xf32>
    %c0_39 = arith.constant 0 : index
    %c0_40 = arith.constant 0 : index
    %38 = vector.load %arg5[%c0_39, %c0_40] : memref<1x256xf32, #tpu.memory_space<vmem>>, vector<1x256xf32>
    %39 = vector.broadcast %38 : vector<1x256xf32> to vector<16x256xf32>
    %40 = arith.addf %37, %39 : vector<16x256xf32>
    %c0_41 = arith.constant 0 : index
    %c0_42 = arith.constant 0 : index
    %41 = vector.load %arg6[%c0_41, %c0_42] : memref<128x256xf32, #tpu.memory_space<vmem>>, vector<128x256xf32>
    %cst_43 = arith.constant dense<0.000000e+00> : vector<16x256xf32>
    %42 = tpu.matmul %1, %41, %cst_43 {dimension_numbers = #tpu.dot_dimension_numbers<[1], [0], [0], [1], [0, 0, 1, 1], [], []>} : vector<16x128xf32>, vector<128x256xf32>, vector<16x256xf32> -> vector<16x256xf32>
    %43 = arith.addf %40, %42 : vector<16x256xf32>
    %c0_44 = arith.constant 0 : index
    %c0_45 = arith.constant 0 : index
    %44 = vector.load %arg7[%c0_44, %c0_45] : memref<1x256xf32, #tpu.memory_space<vmem>>, vector<1x256xf32>
    %45 = vector.broadcast %44 : vector<1x256xf32> to vector<16x256xf32>
    %46 = arith.addf %43, %45 : vector<16x256xf32>
    %cst_46 = arith.constant 0.000000e+00 : f32
    %47 = vector.broadcast %cst_46 : f32 to vector<16x256xf32>
    %48 = arith.maximumf %46, %47 : vector<16x256xf32>
    %c0_47 = arith.constant 0 : index
    %c0_48 = arith.constant 0 : index
    %c0_49 = arith.constant 0 : index
    %49 = vector.load %arg8[%c0_47, %c0_48, %c0_49] : memref<1x16x256xf32, #tpu.memory_space<vmem>>, vector<1x16x256xf32>
    %50 = vector.shape_cast %49 : vector<1x16x256xf32> to vector<16x256xf32>
    %51 = vector.shape_cast %48 : vector<16x256xf32> to vector<1x16x256xf32>
    tpu.vector_store %arg8[%c0_47, %c0_48, %c0_49], %51 {strides = array<i32>} : memref<1x16x256xf32, #tpu.memory_space<vmem>>, vector<1x16x256xf32>,
    return
  }
  func.func @transform_0(%arg0: i32) -> (i32, i32, i32) {
    %c0_i32 = arith.constant 0 : i32
    %c0_i32_0 = arith.constant 0 : i32
    %c0_i32_1 = arith.constant 0 : i32
    return %arg0, %c0_i32, %c0_i32_0 : i32, i32, i32
  }
  func.func @transform_1(%arg0: i32) -> (i32, i32) {
    %c0_i32 = arith.constant 0 : i32
    %c0_i32_0 = arith.constant 0 : i32
    %c0_i32_1 = arith.constant 0 : i32
    return %c0_i32, %c0_i32_0 : i32, i32
  }
  func.func @transform_2(%arg0: i32) -> (i32, i32) {
    %c0_i32 = arith.constant 0 : i32
    %c0_i32_0 = arith.constant 0 : i32
    %c0_i32_1 = arith.constant 0 : i32
    return %c0_i32, %c0_i32_0 : i32, i32
  }
  func.func @transform_3(%arg0: i32) -> (i32, i32, i32) {
    %c0_i32 = arith.constant 0 : i32
    %c0_i32_0 = arith.constant 0 : i32
    %c0_i32_1 = arith.constant 0 : i32
    %c0_i32_2 = arith.constant 0 : i32
    return %c0_i32, %c0_i32_0, %c0_i32_1 : i32, i32, i32
  }
  func.func @transform_4(%arg0: i32) -> (i32, i32) {
    %c0_i32 = arith.constant 0 : i32
    %c0_i32_0 = arith.constant 0 : i32
    %c0_i32_1 = arith.constant 0 : i32
    return %c0_i32, %c0_i32_0 : i32, i32
  }
  func.func @transform_5(%arg0: i32) -> (i32, i32) {
    %c0_i32 = arith.constant 0 : i32
    %c0_i32_0 = arith.constant 0 : i32
    %c0_i32_1 = arith.constant 0 : i32
    return %c0_i32, %c0_i32_0 : i32, i32
  }
  func.func @transform_6(%arg0: i32) -> (i32, i32) {
    %c0_i32 = arith.constant 0 : i32
    %c0_i32_0 = arith.constant 0 : i32
    %c0_i32_1 = arith.constant 0 : i32
    return %c0_i32, %c0_i32_0 : i32, i32
  }
  func.func @transform_7(%arg0: i32) -> (i32, i32, i32) {
    %c0_i32 = arith.constant 0 : i32
    %c0_i32_0 = arith.constant 0 : i32
    %c0_i32_1 = arith.constant 0 : i32
    return %arg0, %c0_i32, %c0_i32_0 : i32, i32, i32
  }
}

</mosaic_0001>

<bundles_post_ra>
// kernel: tpu_custom_call.1
= control target key start
LH: loop header
LB: loop body
LE: loop exit
PB: predicated region body
PF: predicated region fallthrough
CT: control target
= control target key end

     0   :  { %s2423_s0 = inlined_call_operand.hbm [shape: f32[2,16,128], index: 0, kind: input, shape index: {}]   ;;  %s2424_s1 = inlined_call_operand.hbm [shape: f32[128,256], index: 1, kind: input, shape index: {}]   ;;  %s2425_s2 = inlined_call_operand.hbm [shape: f32[1,256], index: 2, kind: input, shape index: {}]   ;;  %s2426_s3 = inlined_call_operand.hbm [shape: f32[5,256,256], index: 3, kind: input, shape index: {}]   ;;  %s2427_s4 = inlined_call_operand.hbm [shape: f32[1,256], index: 4, kind: input, shape index: {}]   ;;  %s2428_s5 = inlined_call_operand.hbm [shape: f32[128,256], index: 5, kind: input, shape index: {}]   ;;  %s2429_s6 = inlined_call_operand.hbm [shape: f32[1,256], index: 6, kind: input, shape index: {}]   ;;  %s2430_s7 = inlined_call_operand.hbm [shape: f32[2,16,256], index: 7, kind: output, shape index: {}]  }
   0x1   :  { %2435 = sst [smem:[#allocation21_spill]] %s2424_s1 }
   0x2   :  { %12 = vsyncpa [#allocation4], 0 }
   0x3   :  { %14 = vsyncpa [#allocation4 + $0x1], 0 }
   0x4   :  { %15 = vsyncpa [#allocation7], 0 }
   0x5   :  { %16 = vsyncpa [#allocation10], 0 }
   0x6   :  { %17 = vsyncpa [#allocation13], 0 }
   0x7   :  { %18 = vsyncpa [#allocation5], 0 }
   0x8   :  { %20 = vsyncpa [#allocation5 + $0x1], 0  ;;  %s2112_s24 = smov 0   ;;  %s2114_s25 = smov 0  }
   0x9   :  { %s2116_s26 = smov 0   ;;  %s2118_s27 = smov 0  }
   0xa LB: > { %s2057_s28 = smov [#allocation6]   ;;  %s2133_s30 = sadd.s32 4294967295, %s2055_s27   ;;  %s2055_s27 = sphi %s2118_s27, %s2460_s27   ;;  %s2051_s26 = sphi %s2116_s26, %s2459_s26   ;;  %s2047_s25 = sphi %s2114_s25, %s2458_s25   ;;  %s2043_s24 = sphi %s2112_s24, %s2457_s24  }
   0xb   : > { %s221_s29 = sshll.u32 %s2057_s28, 4  ;;  %p1651_p0 = scmp.ge.s32.totalorder %s2055_s27, 1  ;;  %s222_s29 = int_to_ptr.vmem [resolvable:$true] %s221_s29 }
   0xc   : > { %p2431_p1 = scmp.eq.s32.totalorder %s2133_s30, 0  ;;  %p209_p2 = scmp.lt.s32.totalorder %s2055_s27, 3 }
   0xd   : > { %s2058_s9 = smov [#allocation9]   ;;  %s2059_s12 = smov [#allocation12]  }
   0xe   : > { %p2138_p3 = pnand %p1651_p0, %p209_p2  ;;  %s245_s10 = sshll.u32 %s2058_s9, 4  ;;  %s2151_s10 = int_to_ptr.vmem [resolvable:$true] %s245_s10 }
   0xf   : > { %s269_s13 = sshll.u32 %s2059_s12, 4  ;;  %s1806_s15 = scalar_lea.vmem %s222_s29, 4096  ;;  %s2153_s13 = int_to_ptr.vmem [resolvable:$true] %s269_s13 }
  0x10   : > { %s2436_s8 = scalar_select %p2138_p3, 1, 0 }
  0x11   : > { %p1706_p5 = pneg %p2138_p3  ;;  %p1807_p8 = scmp.ne.s32.totalorder %s222_s29, %s1806_s15 }
  0x12   : > { %p1814_p11 = scmp.lt.s32.totalorder %s222_s29, %s222_s29  ;;  %p1815_p12 = scmp.lt.s32.totalorder %s1806_s15, %s1806_s15 }
  0x13   : > { %p2147_p6 = pnand %p1706_p5, %p2431_p1 }
  0x14   : > { %p1816_p13 = por %p1815_p12, %p1814_p11 }
  0x15   : > { %p2157_p7 = pneg %p2147_p6 }
  0x17   : > { %p1809_p9 = pnand %p1807_p8, %p2157_p7 }
  0x19   : > { %p1810_p10 = pneg %p1809_p9 }
  0x1b   : > { %p1817_p0 = pnand %p1816_p13, %p1810_p10 }
  0x1d   : > { %1820 = shalt.err (!%p1817_p0)
}
  0x1e   : > { %s2060_s16 = smov 256   ;;  %s2061_s17 = smov 16  }
  0x1f   : > { %s2439_s1 = sld [smem:[#allocation21_spill]]  ;;  %s1832_s20 = scalar_lea.vmem %s2151_s10, 40960 }
  0x20   : > { %p1833_p2 = scmp.ne.s32.totalorder %s2151_s10, %s1832_s20  ;;  %p1840_p9 = scmp.lt.s32.totalorder %s2151_s10, %s2151_s10 }
  0x21   : > { %p1841_p10 = scmp.lt.s32.totalorder %s1832_s20, %s1832_s20 }
  0x22   : > { %p1835_p5 = pnand %p1833_p2, %p2157_p7 }
  0x23   : > { %p1842_p11 = por %p1841_p10, %p1840_p9 }
  0x24   : > { %p1836_p8 = pneg %p1835_p5 }
  0x25   : > { %1709 = dma.hbm_to_vmem [thread:$0]  (!%p2147_p6), %s2439_s1, 4096, %s222_s29, [#allocation7], %s2060_s16, %s2060_s16, %s2061_s17  }
  0x26   : > { %p1843_p12 = pnand %p1842_p11, %p1836_p8 }
  0x28   : > { %1846 = shalt.err (!%p1843_p12)
}
  0x29   : > { %1715 = dma.hbm_to_vmem [thread:$0]  (!%p2147_p6), %s2426_s3, 40960, %s2151_s10, [#allocation10], %s2060_s16, %s2060_s16, %s2061_s17  }
  0x2a   : > { %s1858_s23 = scalar_lea.vmem %s2153_s13, 4096  ;;  %p1866_p5 = scmp.lt.s32.totalorder %s2153_s13, %s2153_s13 }
  0x2b   : > { %p1859_p13 = scmp.ne.s32.totalorder %s2153_s13, %s1858_s23  ;;  %p1867_p8 = scmp.lt.s32.totalorder %s1858_s23, %s1858_s23 }
  0x2d   : > { %p1861_p0 = pnand %p1859_p13, %p2157_p7  ;;  %p1868_p9 = por %p1867_p8, %p1866_p5 }
  0x2f   : > { %p1862_p2 = pneg %p1861_p0 }
  0x31   : > { %p1869_p10 = pnand %p1868_p9, %p1862_p2 }
  0x33   : > { %1872 = shalt.err (!%p1869_p10)
}
  0x34   : > { %1721 = dma.hbm_to_vmem [thread:$0]  (!%p2147_p6), %s2428_s5, 4096, %s2153_s13, [#allocation13], %s2060_s16, %s2060_s16, %s2061_s17  }
  0x35   : > { %s2062_s9 = smov [#allocation8]   ;;  %s2063_s12 = smov [#allocation11]  }
  0x36   : > { %s235_s10 = sshll.u32 %s2062_s9, 4  ;;  %s259_s15 = sshll.u32 %s2063_s12, 4  ;;  %s236_s10 = int_to_ptr.vmem [resolvable:$true] %s235_s10  ;;  %s260_s15 = int_to_ptr.vmem [resolvable:$true] %s259_s15 }
  0x37   : > { %s1884_s18 = scalar_lea.vmem %s236_s10, 32  ;;  %p1892_p0 = scmp.lt.s32.totalorder %s236_s10, %s236_s10 }
  0x38   : > { %p1885_p11 = scmp.ne.s32.totalorder %s236_s10, %s1884_s18  ;;  %p1893_p2 = scmp.lt.s32.totalorder %s1884_s18, %s1884_s18 }
  0x3a   : > { %p1887_p12 = pnand %p1885_p11, %p2157_p7  ;;  %p1894_p5 = por %p1893_p2, %p1892_p0 }
  0x3c   : > { %p1888_p13 = pneg %p1887_p12 }
  0x3e   : > { %p1895_p8 = pnand %p1894_p5, %p1888_p13 }
  0x40   : > { %1898 = shalt.err (!%p1895_p8)
}
  0x41   : > { %1712 = dma.hbm_to_vmem [thread:$0]  (!%p2147_p6), %s2425_s2, 32, %s236_s10, [#allocation7]  }
  0x42   : > { %s1910_s13 = scalar_lea.vmem %s260_s15, 32  ;;  %p1918_p11 = scmp.lt.s32.totalorder %s260_s15, %s260_s15 }
  0x43   : > { %p1911_p9 = scmp.ne.s32.totalorder %s260_s15, %s1910_s13  ;;  %p1919_p12 = scmp.lt.s32.totalorder %s1910_s13, %s1910_s13 }
  0x45   : > { %p1913_p10 = pnand %p1911_p9, %p2157_p7  ;;  %p1920_p1 = por %p1919_p12, %p1918_p11 }
  0x47   : > { %p1914_p4 = pneg %p1913_p10 }
  0x49   : > { %p1921_p3 = pnand %p1920_p1, %p1914_p4 }
  0x4b   : > { %1924 = shalt.err (!%p1921_p3)
}
  0x4c   : > { %1718 = dma.hbm_to_vmem [thread:$0]  (!%p2147_p6), %s2427_s4, 32, %s260_s15, [#allocation10]  }
  0x4d   : > { %s2064_s21 = smov [#allocation14]  }
  0x4e   : > { %s283_s22 = sshll.u32 %s2064_s21, 4  ;;  %s284_s22 = int_to_ptr.vmem [resolvable:$true] %s283_s22 }
  0x4f   : > { %s1936_s23 = scalar_lea.vmem %s284_s22, 32  ;;  %p1944_p5 = scmp.lt.s32.totalorder %s284_s22, %s284_s22 }
  0x50   : > { %p1937_p13 = scmp.ne.s32.totalorder %s284_s22, %s1936_s23  ;;  %p1945_p8 = scmp.lt.s32.totalorder %s1936_s23, %s1936_s23 }
  0x52   : > { %p1939_p0 = pnand %p1937_p13, %p2157_p7  ;;  %p1946_p9 = por %p1945_p8, %p1944_p5 }
  0x54   : > { %p1940_p2 = pneg %p1939_p0 }
  0x56   : > { %p1947_p1 = pnand %p1946_p9, %p1940_p2 }
  0x58   : > { %1950 = shalt.err (!%p1947_p1)
}
  0x59   : > { %1724 = dma.hbm_to_vmem [thread:$0]  (!%p2147_p6), %s2429_s6, 32, %s284_s22, [#allocation13]  }
  0x5a   : > { %s1650_s14 = sadd.s32 4294967294, %s2055_s27   ;;  %s2215_s11 = sadd.s32 1, %s2055_s27  }
  0x5b   : > { %s30_s9 = ssub.s32 %s2055_s27, %s2215_s11  ;;  %s33_s10 = sadd.s32 1, %s2051_s26 }
  0x5c   : > { %p31_p3 = scmp.eq.s32.totalorder %s30_s9, 0  ;;  %p40_p4 = scmp.ne.s32.totalorder %s2051_s26, %s2047_s25 }
  0x5d   : > { %p41_p7 = scmp.eq.s32.totalorder %s2055_s27, 0  ;;  %p46_p10 = scmp.ne.s32.totalorder %s2047_s25, %s2043_s24 }
  0x5e   : > { %s2226_s12 = scalar_select %p31_p3, %s2051_s26, %s33_s10  }
  0x5f   : > { %p2228_p11 = por %p41_p7, %p40_p4  ;;  %p2441_p12 = scmp.eq.s32.totalorder %s2133_s30, 0 }
  0x60   : > { %p196_p13 = scmp.eq.s32.totalorder %s2133_s30, 1  ;;  %p202_p0 = scmp.eq.s32.totalorder %s1650_s14, 1 }
  0x61   : > { %p2234_p6 = por %p2441_p12, %p46_p10  ;;  %p1739_p2 = scmp.lt.s32.totalorder %s2055_s27, 2 }
  0x62   : > { %s294_s19 = sand.u32 1, %s2051_s26   ;;  %p2241_p5 = por %p196_p13, %p40_p4 }
  0x63   : > { %s2442_s18 = scalar_select %p2234_p6, 1, 0 }
  0x64   : > { %s2443_s20 = scalar_select %p2241_p5, 1, 0 }
  0x65   : > { %p2245_p8 = por %p202_p0, %p46_p10  ;;  %s1659_s16 = sshll.u32 %s294_s19, 4 }
  0x66   : > { %s1676_s17 = sshll.u32 %s2055_s27, 8  ;;  %s298_s28 = scalar_lea.vmem [#allocation3], %s1659_s16 }
  0x67   : > { %s2444_s13 = scalar_select %p2245_p8, 1, 0 }
  0x68   : > { %s2253_s23 = scalar_lea.hbm %s2423_s0, %s1676_s17  ;;  %s305_s29 = sshll.u32 %s298_s28, 4  ;;  %s2255_s29 = int_to_ptr.vmem [resolvable:$true] %s305_s29 }
  0x69   : > { %p2259_p9 = pnand %p1739_p2, %p2228_p11  ;;  %s2263_s9 = scalar_lea.sflag [#allocation4], %s294_s19 }
  0x6a   : > { %s1951_s10 = scalar_lea.hbm %s2253_s23, 256  ;;  %s1956_s16 = scalar_lea.hbm %s2423_s0, 512 }
  0x6b   : > { %p1952_p1 = scmp.ne.s32.totalorder %s2253_s23, %s1951_s10  ;;  %p1953_p3 = pneg %p2259_p9 }
  0x6c   : > { %p1957_p10 = scmp.lt.s32.totalorder %s2253_s23, %s2423_s0  ;;  %p1958_p11 = scmp.lt.s32.totalorder %s1956_s16, %s1951_s10 }
  0x6d   : > { %p1954_p4 = pnand %p1953_p3, %p1952_p1 }
  0x6e   : > { %p1959_p12 = por %p1958_p11, %p1957_p10 }
  0x6f   : > { %p1955_p7 = pneg %p1954_p4 }
  0x71   : > { %p1960_p13 = pnand %p1959_p12, %p1955_p7 }
  0x73   : > { %1963 = shalt.err (!%p1960_p13)
}
  0x74   : > { %s1964_s15 = scalar_lea.vmem %s2255_s29, 256  ;;  %s2065_s19 = smov [#allocation3]  }
  0x75   : > { %p1965_p0 = scmp.ne.s32.totalorder %s2255_s29, %s1964_s15  ;;  %s1969_s1 = sshll.u32 %s2065_s19, 4  ;;  %s1970_s1 = int_to_ptr.vmem [resolvable:$false] %s1969_s1 }
  0x76   : > { %s1971_s17 = scalar_lea.vmem %s1970_s1, 512  ;;  %p1972_p4 = scmp.lt.s32.totalorder %s2255_s29, %s1970_s1 }
  0x77   : > { %p1967_p2 = pnand %p1965_p0, %p1953_p3  ;;  %p1973_p8 = scmp.lt.s32.totalorder %s1971_s17, %s1964_s15 }
  0x79   : > { %p1968_p1 = pneg %p1967_p2  ;;  %p1974_p5 = por %p1973_p8, %p1972_p4 }
  0x7b   : > { %p1975_p6 = pnand %p1974_p5, %p1968_p1 }
  0x7d   : > { %1978 = shalt.err (!%p1975_p6)
}
  0x7e   : > { %s2066_s10 = smov 128   ;;  %s2067_s21 = smov 8  }
  0x7f   : > { %1728 = dma.hbm_to_vmem [thread:$0]  (!%p2259_p9), %s2253_s23, 256, %s2255_s29, %s2263_s9, %s2066_s10, %s2066_s10, %s2067_s21  }
  0x80   : > { %p2446_p3 = scmp.ne.s32.totalorder %s2436_s8, 0 }
  0x81   : > { %s2287_s16 = sand.u32 (!%p2446_p3), 1, %s2047_s25   ;;  %p2447_p6 = scmp.ne.s32.totalorder (!%p2446_p3), %s2442_s18, 0 }
  0x82   : > { %317 = sbr.rel (%p2446_p3) target bundleno = 748 (0x2ec), region = 48  ;;  %s1663_s1 = sshll.u32 (!%p2446_p3), %s2287_s16, 4 }
  0x83   : > { %s320_s22 = scalar_lea.sflag (!%p2446_p3), [#allocation4], %s2287_s16  ;;  %s2291_s28 = scalar_lea.vmem (!%p2446_p3), [#allocation3], %s1663_s1 }
  0x87   : > { %2022 = dma.done.wait (%p2447_p6), %s320_s22, 256  }
  0x88   : > { %2024 = vsyncadd (%p2447_p6), %s320_s22, 4294967040  ;;  %p2448_p5 = scmp.eq.s32.totalorder %s2133_s30, 0 }
  0x8a   : > { %2026 = dma.done.wait (%p2448_p5), [#allocation7], 4128   ;;  %p2449_p8 = pmov %p2448_p5 }
  0x8b   : > { %p2450_p9 = pmov %p2448_p5 }
  0x8c   : > { %2028 = vsyncadd (%p2449_p8), [#allocation7], 4294963168 }
  0x8d   : > { %2030 = dma.done.wait (%p2450_p9), [#allocation10], 40992   ;;  %p2451_p7 = pmov %p2448_p5 }
  0x8e   : > { %p2452_p10 = pmov %p2448_p5 }
  0x8f   : > { %2032 = vsyncadd (%p2451_p7), [#allocation10], 4294926304 }
  0x90   : > { %2034 = dma.done.wait (%p2452_p10), [#allocation13], 4128   ;;  %p2453_p11 = pmov %p2448_p5 }
  0x91   : > { %v2068_v0 = vmov 0.0   ;;  %v411_v1 = vld [vmem:[#allocation6 + $0xf8] sm:$0xff]  ;;  %v410_v2 = vld [vmem:[#allocation6 + $0xf0] sm:$0xff]  ;;  %v409_v3 = vld [vmem:[#allocation6 + $0xe8] sm:$0xff]  ;;  %vm515_vm0 = vcmask 1041408   ;;  %vm677_vm1 = vcmask 1046528  }
  0x92   : > { %2036 = vsyncadd (%p2453_p11), [#allocation13], 4294963168  ;;  %488 = vmatprep.mubr.f32.mxu0 %v2068_v0  ;;  %505 = vst [vmem:[#allocation2 + $0x28] sm:$0xff] %v2068_v0  ;;  %424 = vmatprep.subr.mxu0 %v411_v1  ;;  %v408_v4 = vld [vmem:[#allocation6 + $0xe0] sm:$0xff]  ;;  %v407_v5 = vld [vmem:[#allocation6 + $0xd8] sm:$0xff]  ;;  %vm1088_vm2 = vcmask 1044480  }
  0x93   : > { %506 = vst [vmem:[#allocation2 + $0x10] sm:$0xff] %v2068_v0  ;;  %509 = vst [vmem:[#allocation2 + $0x18] sm:$0xf] %v2068_v0  ;;  %425 = vmatpush1.msra.mxu0 %v410_v2  ;;  %v406_v6 = vld [vmem:[#allocation6 + $0xd0] sm:$0xff]  ;;  %v405_v7 = vld [vmem:[#allocation6 + $0xc8] sm:$0xff]  ;;  %vm919_vm3 = vcmask 1045504  }
  0x94   : > { %510 = vst [vmem:[#allocation2 + $0x20] sm:$0xf] %v2068_v0  ;;  %426 = vmatprep.subr.mxu0 %v409_v3  ;;  %v404_v8 = vld [vmem:[#allocation6 + $0xc0] sm:$0xff]  ;;  %v403_v9 = vld [vmem:[#allocation6 + $0xb8] sm:$0xff]  ;;  %v402_v10 = vld [vmem:[#allocation6 + $0xb0] sm:$0xff]  ;;  %vm1257_vm4 = vcmask 1043456  }
  0x95   : > { %427 = vmatpush1.msra.mxu0 %v408_v4  ;;  %v401_v11 = vld [vmem:[#allocation6 + $0xa8] sm:$0xff]  ;;  %v400_v12 = vld [vmem:[#allocation6 + $0xa0] sm:$0xff]  ;;  %v399_v13 = vld [vmem:[#allocation6 + $0x98] sm:$0xff]  ;;  %s1670_s8 = sshll.u32 %s2287_s16, 5  ;;  %s1677_s29 = sshll.u32 %s2133_s30, 9 }
  0x96   : > { %428 = vmatprep.subr.mxu0 %v407_v5  ;;  %v398_v14 = vld [vmem:[#allocation6 + $0x90] sm:$0xff]  ;;  %v397_v15 = vld [vmem:[#allocation6 + $0x88] sm:$0xff]  ;;  %v396_v16 = vld [vmem:[#allocation6 + $0x80] sm:$0xff]  ;;  %s377_s18 = scalar_lea.vmem [#allocation15], %s1670_s8  ;;  %s2380_s15 = scalar_lea.hbm %s2430_s7, %s1677_s29 }
  0x97   : > { %429 = vmatpush1.msra.mxu0 %v406_v6  ;;  %v395_v17 = vld [vmem:[#allocation6 + $0x78] sm:$0xff]  ;;  %v394_v20 = vld [vmem:[#allocation6 + $0x70] sm:$0xff]  ;;  %v393_v22 = vld [vmem:[#allocation6 + $0x68] sm:$0xff]  ;;  %s1520_s23 = sshll.u32 %s377_s18, 4  ;;  %s1507_s19 = scalar_lea.sflag [#allocation5], %s2287_s16  ;;  %s2375_s23 = int_to_ptr.vmem [resolvable:$true] %s1520_s23 }
  0x98   : > { %430 = vmatprep.subr.mxu0 %v405_v7  ;;  %v638_v18 = vld [vmem:[#allocation9 + $0x2f8] sm:$0xff]  ;;  %v637_v19 = vld [vmem:[#allocation9 + $0x2f0] sm:$0xff]  ;;  %v636_v21 = vld [vmem:[#allocation9 + $0x2e8] sm:$0xff]  ;;  %s1979_s17 = scalar_lea.vmem %s2375_s23, 512  ;;  %p2454_p13 = scmp.ne.s32.totalorder %s2443_s20, 0 }
  0x99   : > { %431 = vmatpush1.msra.mxu0 %v404_v8  ;;  %692 = vmatprep.subr.mxu1 %v638_v18  ;;  %v635_v23 = vld [vmem:[#allocation9 + $0x2e0] sm:$0xff]  ;;  %v634_v24 = vld [vmem:[#allocation9 + $0x2d8] sm:$0xff]  ;;  %v633_v26 = vld [vmem:[#allocation9 + $0x2d0] sm:$0xff]  ;;  %p1980_p12 = scmp.ne.s32.totalorder %s2375_s23, %s1979_s17  ;;  %s2069_s30 = smov [#allocation15]  }
  0x9a   : > { %432 = vmatprep.subr.mxu0 %v403_v9  ;;  %693 = vmatpush1.msra.mxu1 %v637_v19  ;;  %v392_v25 = vld [vmem:[#allocation6 + $0x60] sm:$0xff]  ;;  %v391_v27 = vld [vmem:[#allocation6 + $0x58] sm:$0xff]  ;;  %v632_v28 = vld [vmem:[#allocation9 + $0x2c8] sm:$0xff]  ;;  %s1983_s10 = sshll.u32 %s2069_s30, 4  ;;  %s1984_s10 = int_to_ptr.vmem [resolvable:$false] %s1983_s10 }
  0x9b   : > { %433 = vmatpush1.msra.mxu0 %v402_v10  ;;  %694 = vmatprep.subr.mxu1 %v636_v21  ;;  %v390_v29 = vld [vmem:[#allocation6 + $0x50] sm:$0xff]  ;;  %v631_v30 = vld [vmem:[#allocation9 + $0x2c0] sm:$0xff]  ;;  %v630_v32 = vld [vmem:[#allocation9 + $0x2b8] sm:$0xff]  ;;  %p1981_p0 = pnand %p1980_p12, %p2454_p13  ;;  %s1985_s21 = scalar_lea.vmem %s1984_s10, 1024 }
  0x9c   : > { %434 = vmatprep.subr.mxu0 %v401_v11  ;;  %695 = vmatpush1.msra.mxu1 %v635_v23  ;;  %v389_v31 = vld [vmem:[#allocation6 + $0x48] sm:$0xff]  ;;  %v388_v33 = vld [vmem:[#allocation6 + $0x40] sm:$0xff]  ;;  %v629_v34 = vld [vmem:[#allocation9 + $0x2b0] sm:$0xff]  ;;  %p1986_p1 = scmp.lt.s32.totalorder %s2375_s23, %s1984_s10  ;;  %p1987_p4 = scmp.lt.s32.totalorder %s1985_s21, %s1979_s17 }
  0x9d   : > { %435 = vmatpush1.msra.mxu0 %v400_v12  ;;  %696 = vmatprep.subr.mxu1 %v634_v24  ;;  %v387_v35 = vld [vmem:[#allocation6 + $0x38] sm:$0xff]  ;;  %v628_v36 = vld [vmem:[#allocation9 + $0x2a8] sm:$0xff]  ;;  %v627_v38 = vld [vmem:[#allocation9 + $0x2a0] sm:$0xff]  ;;  %p1982_p2 = pneg %p1981_p0 }
  0x9e   : > { %436 = vmatprep.subr.mxu0 %v399_v13  ;;  %697 = vmatpush1.msra.mxu1 %v633_v26  ;;  %v386_v37 = vld [vmem:[#allocation6 + $0x30] sm:$0xff]  ;;  %v385_v39 = vld [vmem:[#allocation6 + $0x28] sm:$0xff]  ;;  %v626_v40 = vld [vmem:[#allocation9 + $0x298] sm:$0xff]  ;;  %p1988_p3 = por %p1987_p4, %p1986_p1 }
  0x9f   : > { %437 = vmatpush1.msra.mxu0 %v398_v14  ;;  %698 = vmatprep.subr.mxu1 %v632_v28  ;;  %v384_v41 = vld [vmem:[#allocation6 + $0x20] sm:$0xff]  ;;  %v625_v42 = vld [vmem:[#allocation9 + $0x290] sm:$0xff]  ;;  %v624_v44 = vld [vmem:[#allocation9 + $0x288] sm:$0xff] }
  0xa0   : > { %438 = vmatprep.subr.mxu0 %v397_v15  ;;  %699 = vmatpush1.msra.mxu1 %v631_v30  ;;  %v383_v43 = vld [vmem:[#allocation6 + $0x18] sm:$0xff]  ;;  %v382_v45 = vld [vmem:[#allocation6 + $0x10] sm:$0xff]  ;;  %v623_v46 = vld [vmem:[#allocation9 + $0x280] sm:$0xff]  ;;  %p1989_p6 = pnand %p1988_p3, %p1982_p2 }
  0xa1   : > { %439 = vmatpush1.msra.mxu0 %v396_v16  ;;  %700 = vmatprep.subr.mxu1 %v630_v32  ;;  %v381_v47 = vld [vmem:[#allocation6 + $0x8] sm:$0xff]  ;;  %v622_v48 = vld [vmem:[#allocation9 + $0x278] sm:$0xff]  ;;  %v621_v50 = vld [vmem:[#allocation9 + $0x270] sm:$0xff] }
  0xa2   : > { %440 = vmatprep.subr.mxu0 %v395_v17  ;;  %701 = vmatpush1.msra.mxu1 %v629_v34  ;;  %v380_v49 = vld [vmem:[#allocation6] sm:$0xff]  ;;  %v568_v53 = vld [vmem:[#allocation9 + $0xf0] sm:$0xff]  ;;  %v567_v54 = vld [vmem:[#allocation9 + $0xe8] sm:$0xff] }
  0xa3   : > { %441 = vmatpush1.msra.mxu0 %v394_v20  ;;  %702 = vmatprep.subr.mxu1 %v628_v36  ;;  %v378_v51 = vld [vmem:[%s2291_s28] sm:$0xff]  ;;  %v379_v58 = vld [vmem:[%s2291_s28 + $0x8] sm:$0xff] }
  0xa4   : > { %442 = vmatprep.subr.mxu0 %v393_v22  ;;  %703 = vmatpush1.msra.mxu1 %v627_v38  ;;  %v569_v52 = vld [vmem:[#allocation9 + $0xf8] sm:$0xff]  ;;  %v620_v55 = vld [vmem:[#allocation9 + $0x268] sm:$0xff]  ;;  %v566_v56 = vld [vmem:[#allocation9 + $0xe0] sm:$0xff] }
  0xa5   : > { %443 = vmatpush1.msra.mxu0 %v392_v25  ;;  %704 = vmatprep.subr.mxu1 %v626_v40  ;;  %v619_v57 = vld [vmem:[#allocation9 + $0x260] sm:$0xff]  ;;  %v565_v59 = vld [vmem:[#allocation9 + $0xd8] sm:$0xff]  ;;  %v564_v60 = vld [vmem:[#allocation9 + $0xd0] sm:$0xff] }
  0xa6   : > { %444 = vmatprep.subr.mxu0 %v391_v27  ;;  %705 = vmatpush1.msra.mxu1 %v625_v42  ;;  %v618_v61 = vld [vmem:[#allocation9 + $0x258] sm:$0xff]  ;;  %v563_v62 = vld [vmem:[#allocation9 + $0xc8] sm:$0xff]  ;;  %v617_v63 = vld [vmem:[#allocation9 + $0x250] sm:$0xff] }
  0xa7   : > { %445 = vmatpush1.msra.mxu0 %v390_v29  ;;  %706 = vmatprep.subr.mxu1 %v624_v44  ;;  %v562_v1 = vld [vmem:[#allocation9 + $0xc0] sm:$0xff]  ;;  %v616_v2 = vld [vmem:[#allocation9 + $0x248] sm:$0xff]  ;;  %v561_v3 = vld [vmem:[#allocation9 + $0xb8] sm:$0xff] }
  0xa8   : > { %446 = vmatprep.subr.mxu0 %v389_v31  ;;  %707 = vmatpush1.msra.mxu1 %v623_v46  ;;  %v615_v4 = vld [vmem:[#allocation9 + $0x240] sm:$0xff]  ;;  %v560_v5 = vld [vmem:[#allocation9 + $0xb0] sm:$0xff]  ;;  %v614_v6 = vld [vmem:[#allocation9 + $0x238] sm:$0xff] }
  0xa9   : > { %447 = vmatpush1.msra.mxu0 %v388_v33  ;;  %708 = vmatprep.subr.mxu1 %v622_v48  ;;  %v559_v7 = vld [vmem:[#allocation9 + $0xa8] sm:$0xff]  ;;  %v613_v8 = vld [vmem:[#allocation9 + $0x230] sm:$0xff]  ;;  %v558_v9 = vld [vmem:[#allocation9 + $0xa0] sm:$0xff] }
  0xaa   : > { %448 = vmatprep.subr.mxu0 %v387_v35  ;;  %709 = vmatpush1.msra.mxu1 %v621_v50  ;;  %v612_v10 = vld [vmem:[#allocation9 + $0x228] sm:$0xff]  ;;  %v557_v11 = vld [vmem:[#allocation9 + $0x98] sm:$0xff]  ;;  %v611_v12 = vld [vmem:[#allocation9 + $0x220] sm:$0xff] }
  0xab   : > { %449 = vmatpush1.msra.mxu0 %v386_v37  ;;  %710 = vmatprep.subr.mxu1 %v620_v55  ;;  %v556_v13 = vld [vmem:[#allocation9 + $0x90] sm:$0xff]  ;;  %v610_v14 = vld [vmem:[#allocation9 + $0x218] sm:$0xff]  ;;  %v555_v15 = vld [vmem:[#allocation9 + $0x88] sm:$0xff] }
  0xac   : > { %450 = vmatprep.subr.mxu0 %v385_v39  ;;  %711 = vmatpush1.msra.mxu1 %v619_v57  ;;  %v609_v16 = vld [vmem:[#allocation9 + $0x210] sm:$0xff]  ;;  %v554_v17 = vld [vmem:[#allocation9 + $0x80] sm:$0xff]  ;;  %v608_v18 = vld [vmem:[#allocation9 + $0x208] sm:$0xff] }
  0xad   : > { %451 = vmatpush1.msra.mxu0 %v384_v41  ;;  %712 = vmatprep.subr.mxu1 %v618_v61  ;;  %v553_v19 = vld [vmem:[#allocation9 + $0x78] sm:$0xff]  ;;  %v607_v20 = vld [vmem:[#allocation9 + $0x200] sm:$0xff]  ;;  %v552_v21 = vld [vmem:[#allocation9 + $0x70] sm:$0xff] }
  0xae   : > { %452 = vmatprep.subr.mxu0 %v383_v43  ;;  %713 = vmatpush1.msra.mxu1 %v617_v63  ;;  %v670_v22 = vld [vmem:[#allocation9 + $0x3f8] sm:$0xff]  ;;  %v551_v23 = vld [vmem:[#allocation9 + $0x68] sm:$0xff]  ;;  %v669_v24 = vld [vmem:[#allocation9 + $0x3f0] sm:$0xff] }
  0xaf   : > { %453 = vmatpush1.msra.mxu0 %v382_v45  ;;  %714 = vmatprep.subr.mxu1 %v616_v2  ;;  %v550_v25 = vld [vmem:[#allocation9 + $0x60] sm:$0xff]  ;;  %v668_v26 = vld [vmem:[#allocation9 + $0x3e8] sm:$0xff]  ;;  %v549_v27 = vld [vmem:[#allocation9 + $0x58] sm:$0xff] }
  0xb0   : > { %454 = vmatprep.subr.mxu0 %v381_v47  ;;  %715 = vmatpush1.msra.mxu1 %v615_v4  ;;  %v667_v28 = vld [vmem:[#allocation9 + $0x3e0] sm:$0xff]  ;;  %v548_v29 = vld [vmem:[#allocation9 + $0x50] sm:$0xff]  ;;  %v666_v30 = vld [vmem:[#allocation9 + $0x3d8] sm:$0xff] }
  0xb1   : > { %455 = vmatpush1.msra.mxu0 %v380_v49  ;;  %716 = vmatprep.subr.mxu1 %v614_v6  ;;  %v547_v31 = vld [vmem:[#allocation9 + $0x48] sm:$0xff]  ;;  %v665_v32 = vld [vmem:[#allocation9 + $0x3d0] sm:$0xff]  ;;  %v546_v33 = vld [vmem:[#allocation9 + $0x40] sm:$0xff] }
  0xb2   : > { %489 = vmatmul.mubr.f32.vlgmr.msra.gmra.mxu0 %v378_v51  ;;  %769 = vmatprep.subr.mxu0 %v569_v52  ;;  %v664_v34 = vld [vmem:[#allocation9 + $0x3c8] sm:$0xff]  ;;  %v545_v35 = vld [vmem:[#allocation9 + $0x38] sm:$0xff]  ;;  %v544_v36 = vld [vmem:[#allocation9 + $0x30] sm:$0xff] }
  0xb3   : > { %494 = vmatprep.mubr.f32.mxu0 %v2068_v0  ;;  %770 = vmatpush1.msra.mxu0 %v568_v53  ;;  %v543_v37 = vld [vmem:[#allocation9 + $0x28] sm:$0xff]  ;;  %v542_v38 = vld [vmem:[#allocation9 + $0x20] sm:$0xff]  ;;  %v541_v39 = vld [vmem:[#allocation9 + $0x18] sm:$0xff] }
  0xb4   : > { %771 = vmatprep.subr.mxu0 %v567_v54  ;;  %717 = vmatpush1.msra.mxu1 %v613_v8  ;;  %v540_v40 = vld [vmem:[#allocation9 + $0x10] sm:$0xff]  ;;  %v539_v41 = vld [vmem:[#allocation9 + $0x8] sm:$0xff]  ;;  %v538_v42 = vld [vmem:[#allocation9] sm:$0xff] }
  0xb5   : > { %772 = vmatpush1.msra.mxu0 %v566_v56  ;;  %718 = vmatprep.subr.mxu1 %v612_v10  ;;  %v601_v43 = vld [vmem:[#allocation9 + $0x1f8] sm:$0xff]  ;;  %v600_v44 = vld [vmem:[#allocation9 + $0x1f0] sm:$0xff]  ;;  %v599_v45 = vld [vmem:[#allocation9 + $0x1e8] sm:$0xff] }
  0xb6   : > { %495 = vmatmul.mubr.f32.gmra.mxu0 %v379_v58  ;;  %773 = vmatprep.subr.mxu0 %v565_v59  ;;  %v598_v46 = vld [vmem:[#allocation9 + $0x1e0] sm:$0xff]  ;;  %v597_v47 = vld [vmem:[#allocation9 + $0x1d8] sm:$0xff]  ;;  %v596_v48 = vld [vmem:[#allocation9 + $0x1d0] sm:$0xff] }
  0xb7   : > { %774 = vmatpush1.msra.mxu0 %v564_v60  ;;  %719 = vmatpush1.msra.mxu1 %v611_v12  ;;  %v595_v49 = vld [vmem:[#allocation9 + $0x1c8] sm:$0xff]  ;;  %v594_v50 = vld [vmem:[#allocation9 + $0x1c0] sm:$0xff]  ;;  %v593_v51 = vld [vmem:[#allocation9 + $0x1b8] sm:$0xff] }
  0xb8   : > { %775 = vmatprep.subr.mxu0 %v563_v62  ;;  %720 = vmatprep.subr.mxu1 %v610_v14  ;;  %v592_v52 = vld [vmem:[#allocation9 + $0x1b0] sm:$0xff]  ;;  %v591_v53 = vld [vmem:[#allocation9 + $0x1a8] sm:$0xff]  ;;  %v590_v54 = vld [vmem:[#allocation9 + $0x1a0] sm:$0xff] }
  0xb9   : > { %776 = vmatpush1.msra.mxu0 %v562_v1  ;;  %721 = vmatpush1.msra.mxu1 %v609_v16  ;;  %v589_v55 = vld [vmem:[#allocation9 + $0x198] sm:$0xff]  ;;  %v588_v56 = vld [vmem:[#allocation9 + $0x190] sm:$0xff]  ;;  %v587_v57 = vld [vmem:[#allocation9 + $0x188] sm:$0xff] }
  0xba   : > { %777 = vmatprep.subr.mxu0 %v561_v3  ;;  %722 = vmatprep.subr.mxu1 %v608_v18  ;;  %v663_v58 = vld [vmem:[#allocation9 + $0x3c0] sm:$0xff]  ;;  %v662_v59 = vld [vmem:[#allocation9 + $0x3b8] sm:$0xff]  ;;  %v661_v60 = vld [vmem:[#allocation9 + $0x3b0] sm:$0xff] }
  0xbb   : > { %778 = vmatpush1.msra.mxu0 %v560_v5  ;;  %723 = vmatpush1.msra.mxu1 %v607_v20  ;;  %v660_v61 = vld [vmem:[#allocation9 + $0x3a8] sm:$0xff]  ;;  %v659_v62 = vld [vmem:[#allocation9 + $0x3a0] sm:$0xff]  ;;  %v658_v1 = vld [vmem:[#allocation9 + $0x398] sm:$0xff] }
  0xbc   : > { %779 = vmatprep.subr.mxu0 %v559_v7  ;;  %724 = vmatprep.subr.mxu1 %v670_v22  ;;  %v586_v63 = vld [vmem:[#allocation9 + $0x180] sm:$0xff]  ;;  %v585_v2 = vld [vmem:[#allocation9 + $0x178] sm:$0xff]  ;;  %v657_v3 = vld [vmem:[#allocation9 + $0x390] sm:$0xff] }
  0xbd   : > { %780 = vmatpush1.msra.mxu0 %v558_v9  ;;  %725 = vmatpush2.msra.mxu1 %v669_v24  ;;  %v584_v4 = vld [vmem:[#allocation9 + $0x170] sm:$0xff]  ;;  %v656_v5 = vld [vmem:[#allocation9 + $0x388] sm:$0xff]  ;;  %v655_v7 = vld [vmem:[#allocation9 + $0x380] sm:$0xff] }
  0xbe   : > { %781 = vmatprep.subr.mxu0 %v557_v11  ;;  %726 = vmatprep.subr.mxu1 %v668_v26  ;;  %v583_v6 = vld [vmem:[#allocation9 + $0x168] sm:$0xff]  ;;  %v582_v8 = vld [vmem:[#allocation9 + $0x160] sm:$0xff]  ;;  %v654_v9 = vld [vmem:[#allocation9 + $0x378] sm:$0xff] }
  0xbf   : > { %782 = vmatpush1.msra.mxu0 %v556_v13  ;;  %727 = vmatpush2.msra.mxu1 %v667_v28  ;;  %v581_v10 = vld [vmem:[#allocation9 + $0x158] sm:$0xff]  ;;  %v653_v11 = vld [vmem:[#allocation9 + $0x370] sm:$0xff]  ;;  %v652_v13 = vld [vmem:[#allocation9 + $0x368] sm:$0xff] }
  0xc0   : > { %783 = vmatprep.subr.mxu0 %v555_v15  ;;  %728 = vmatprep.subr.mxu1 %v666_v30  ;;  %v580_v12 = vld [vmem:[#allocation9 + $0x150] sm:$0xff]  ;;  %v579_v14 = vld [vmem:[#allocation9 + $0x148] sm:$0xff]  ;;  %v651_v15 = vld [vmem:[#allocation9 + $0x360] sm:$0xff] }
  0xc1   : > { %784 = vmatpush1.msra.mxu0 %v554_v17  ;;  %729 = vmatpush2.msra.mxu1 %v665_v32  ;;  %v578_v16 = vld [vmem:[#allocation9 + $0x140] sm:$0xff]  ;;  %v650_v17 = vld [vmem:[#allocation9 + $0x358] sm:$0xff]  ;;  %v576_v20 = vld [vmem:[#allocation9 + $0x130] sm:$0xff] }
  0xc2   : > { %785 = vmatprep.subr.mxu0 %v553_v19  ;;  %730 = vmatprep.subr.mxu1 %v664_v34  ;;  %v577_v18 = vld [vmem:[#allocation9 + $0x138] sm:$0xff]  ;;  %v649_v19 = vld [vmem:[#allocation9 + $0x350] sm:$0xff]  ;;  %v575_v22 = vld [vmem:[#allocation9 + $0x128] sm:$0xff] }
  0xc3   : > { %786 = vmatpush1.msra.mxu0 %v552_v21  ;;  %731 = vmatpush2.msra.mxu1 %v663_v58  ;;  %v648_v21 = vld [vmem:[#allocation9 + $0x348] sm:$0xff]  ;;  %v574_v24 = vld [vmem:[#allocation9 + $0x120] sm:$0xff]  ;;  %v573_v26 = vld [vmem:[#allocation9 + $0x118] sm:$0xff] }
  0xc4   : > { %787 = vmatprep.subr.mxu0 %v551_v23  ;;  %732 = vmatprep.subr.mxu1 %v662_v59  ;;  %v647_v23 = vld [vmem:[#allocation9 + $0x340] sm:$0xff]  ;;  %v572_v28 = vld [vmem:[#allocation9 + $0x110] sm:$0xff]  ;;  %v642_v34 = vld [vmem:[#allocation9 + $0x318] sm:$0xff] }
  0xc5   : > { %788 = vmatpush1.msra.mxu0 %v550_v25  ;;  %733 = vmatpush2.msra.mxu1 %v661_v60  ;;  %v646_v25 = vld [vmem:[#allocation9 + $0x338] sm:$0xff]  ;;  %v570_v30 = vld [vmem:[#allocation9 + $0x100] sm:$0xff] }
  0xc6   : > { %789 = vmatprep.subr.mxu0 %v549_v27  ;;  %734 = vmatprep.subr.mxu1 %v660_v61  ;;  %v645_v27 = vld [vmem:[#allocation9 + $0x330] sm:$0xff]  ;;  %v643_v32 = vld [vmem:[#allocation9 + $0x320] sm:$0xff] }
  0xc7   : > { %790 = vmatpush1.msra.mxu0 %v548_v29  ;;  %735 = vmatpush2.msra.mxu1 %v659_v62  ;;  %v571_v29 = vld [vmem:[#allocation9 + $0x108] sm:$0xff] }
  0xc8   : > { %791 = vmatprep.subr.mxu0 %v547_v31  ;;  %736 = vmatprep.subr.mxu1 %v658_v1  ;;  %v644_v31 = vld [vmem:[#allocation9 + $0x328] sm:$0xff] }
  0xc9   : > { %792 = vmatpush1.msra.mxu0 %v546_v33  ;;  %737 = vmatpush2.msra.mxu1 %v657_v3  ;;  %v1051_v33 = vld [vmem:[#allocation9 + $0x6f8] sm:$0xff] }
  0xca   : > { %793 = vmatprep.subr.mxu0 %v545_v35  ;;  %738 = vmatprep.subr.mxu1 %v656_v5  ;;  %v641_v35 = vld [vmem:[#allocation9 + $0x310] sm:$0xff] }
  0xcb   : > { %794 = vmatpush1.msra.mxu0 %v544_v36  ;;  %739 = vmatpush2.msra.mxu1 %v655_v7  ;;  %v640_v36 = vld [vmem:[#allocation9 + $0x308] sm:$0xff] }
  0xcc   : > { %795 = vmatprep.subr.mxu0 %v543_v37  ;;  %740 = vmatprep.subr.mxu1 %v654_v9  ;;  %v639_v37 = vld [vmem:[#allocation9 + $0x300] sm:$0xff] }
  0xcd   : > { %796 = vmatpush1.msra.mxu0 %v542_v38  ;;  %741 = vmatpush2.msra.mxu1 %v653_v11  ;;  %v882_v38 = vld [vmem:[#allocation9 + $0x4f8] sm:$0xff]  ;;  %v1048_v11 = vld [vmem:[#allocation9 + $0x6e0] sm:$0xff] }
  0xce   : > { %797 = vmatprep.subr.mxu0 %v541_v39  ;;  %742 = vmatprep.subr.mxu1 %v652_v13  ;;  %v414_v39 = vlaneseq }
  0xcf   : > { %798 = vmatpush1.msra.mxu0 %v540_v40  ;;  %743 = vmatpush2.msra.mxu1 %v651_v15 }
  0xd0   : > { %799 = vmatprep.subr.mxu0 %v539_v41  ;;  %744 = vmatprep.subr.mxu1 %v650_v17  ;;  %v415_v40 = vshrl.u32 %v414_v39, 7 }
  0xd1   : > { %800 = vmatpush1.msra.mxu0 %v538_v42  ;;  %745 = vmatpush2.msra.mxu1 %v649_v19  ;;  %v412_v42 = vld [vmem:[#allocation8] sm:$0x3] }
  0xd2   : > { %801 = vmatprep.subr.mxu0 %v601_v43  ;;  %746 = vmatprep.subr.mxu1 %v648_v21  ;;  %v2317_v41 = vsub.s32 0, %v415_v40  ;;  %v2319_v43 = vsub.s32 1, %v415_v40  ;;  %v881_v21 = vld [vmem:[#allocation9 + $0x4f0] sm:$0xff] }
  0xd3   : > { %802 = vmatpush2.msra.mxu0 %v600_v44  ;;  %747 = vmatpush2.msra.mxu1 %v647_v23  ;;  %v1038_v40 = vld [vmem:[#allocation9 + $0x690] sm:$0xff] }
  0xd4   : > { %803 = vmatprep.subr.mxu0 %v599_v45  ;;  %748 = vmatprep.subr.mxu1 %v646_v25  ;;  %v417_v44 = vrot.slane %v412_v42, %v2317_v41  ;;  %v421_v45 = vrot.slane %v412_v42, %v2319_v43  ;;  %v876_v42 = vld [vmem:[#allocation9 + $0x4c8] sm:$0xff] }
  0xd5   : > { %804 = vmatpush2.msra.mxu0 %v598_v46  ;;  %749 = vmatpush2.msra.mxu1 %v645_v27 }
  0xd6   : > { %805 = vmatprep.subr.mxu0 %v597_v47  ;;  %750 = vmatprep.subr.mxu1 %v644_v31 }
  0xd7   : > { %806 = vmatpush2.msra.mxu0 %v596_v48  ;;  %751 = vmatpush2.msra.mxu1 %v643_v32 }
  0xd8   : > { %807 = vmatprep.subr.mxu0 %v595_v49  ;;  %752 = vmatprep.subr.mxu1 %v642_v34  ;;  %v878_v34 = vld [vmem:[#allocation9 + $0x4d8] sm:$0xff] }
  0xd9   : > { %808 = vmatpush2.msra.mxu0 %v594_v50  ;;  %753 = vmatpush2.msra.mxu1 %v641_v35  ;;  %v1040_v35 = vld [vmem:[#allocation9 + $0x6a0] sm:$0xff] }
  0xda   : > { %809 = vmatprep.subr.mxu0 %v593_v51  ;;  %754 = vmatprep.subr.mxu1 %v640_v36  ;;  %v1039_v36 = vld [vmem:[#allocation9 + $0x698] sm:$0xff] }
  0xdb   : > { %810 = vmatpush2.msra.mxu0 %v592_v52  ;;  %755 = vmatpush2.msra.mxu1 %v639_v37  ;;  %v877_v37 = vld [vmem:[#allocation9 + $0x4d0] sm:$0xff] }
  0xdc   : > { %811 = vmatprep.subr.mxu0 %v591_v53  ;;  %934 = vmatprep.subr.mxu1 %v882_v38 }
  0xdd   : > { %812 = vmatpush2.msra.mxu0 %v590_v54 }
  0xde   : > { %813 = vmatprep.subr.mxu0 %v589_v55 }
  0xdf   : > { %814 = vmatpush2.msra.mxu0 %v588_v56 }
  0xe0   : > { %815 = vmatprep.subr.mxu0 %v587_v57 }
  0xe1   : > { %816 = vmatpush2.msra.mxu0 %v586_v63 }
  0xe2   : > { %817 = vmatprep.subr.mxu0 %v585_v2  ;;  %v1050_v2 = vld [vmem:[#allocation9 + $0x6f0] sm:$0xff] }
  0xe3   : > { %818 = vmatpush2.msra.mxu0 %v584_v4 }
  0xe4   : > { %819 = vmatprep.subr.mxu0 %v583_v6 }
  0xe5   : > { %820 = vmatpush2.msra.mxu0 %v582_v8  ;;  %v1049_v8 = vld [vmem:[#allocation9 + $0x6e8] sm:$0xff] }
  0xe6   : > { %821 = vmatprep.subr.mxu0 %v581_v10 }
  0xe7   : > { %822 = vmatpush2.msra.mxu0 %v580_v12 }
  0xe8   : > { %823 = vmatprep.subr.mxu0 %v579_v14  ;;  %v1047_v14 = vld [vmem:[#allocation9 + $0x6d8] sm:$0xff] }
  0xe9   : > { %824 = vmatpush2.msra.mxu0 %v578_v16  ;;  %v1046_v16 = vld [vmem:[#allocation9 + $0x6d0] sm:$0xff] }
  0xea   : > { %825 = vmatprep.subr.mxu0 %v577_v18 }
  0xeb   : > { %826 = vmatpush2.msra.mxu0 %v576_v20  ;;  %v1045_v20 = vld [vmem:[#allocation9 + $0x6c8] sm:$0xff] }
  0xec   : > { %827 = vmatprep.subr.mxu0 %v575_v22 }
  0xed   : > { %828 = vmatpush2.msra.mxu0 %v574_v24  ;;  %v1044_v24 = vld [vmem:[#allocation9 + $0x6c0] sm:$0xff] }
  0xee   : > { %829 = vmatprep.subr.mxu0 %v573_v26  ;;  %v1043_v26 = vld [vmem:[#allocation9 + $0x6b8] sm:$0xff] }
  0xef   : > { %830 = vmatpush2.msra.mxu0 %v572_v28  ;;  %v880_v28 = vld [vmem:[#allocation9 + $0x4e8] sm:$0xff] }
  0xf0   : > { %831 = vmatprep.subr.mxu0 %v571_v29  ;;  %v1042_v29 = vld [vmem:[#allocation9 + $0x6b0] sm:$0xff] }
  0xf1   : > { %832 = vmatpush2.msra.mxu0 %v570_v30  ;;  %v879_v30 = vld [vmem:[#allocation9 + $0x4e0] sm:$0xff] }
  0xf2   : > { %1103 = vmatprep.subr.mxu0 %v1051_v33  ;;  %v1041_v33 = vld [vmem:[#allocation9 + $0x6a8] sm:$0xff] }
 0x172   : > { %v490_v46 = vpop.f32.mrf.mxu0 }
 0x173   : > { %v491_v47 = vadd.f32 %v490_v46, %v417_v44  ;;  %v875_v46 = vld [vmem:[#allocation9 + $0x4c0] sm:$0xff] }
 0x174   : > { %v492_v48 = vpop.f32.mrf.mxu0 }
 0x175   : > { %v501_v49 = vmax.f32 %v491_v47, 0.0  ;;  %v493_v50 = vadd.f32 %v492_v48, %v421_v45  ;;  %v1036_v47 = vld [vmem:[#allocation9 + $0x680] sm:$0xff] }
 0x176   : > { %v496_v51 = vpop.f32.mrf.mxu0 }
 0x177   : > { %v516_v52 = vrot.slane %v501_v49, 6  ;;  %v502_v53 = vmax.f32 %v493_v50, 0.0  ;;  %v497_v54 = vadd.f32 %v496_v51, %v417_v44  ;;  %v874_v49 = vld [vmem:[#allocation9 + $0x4b8] sm:$0xff]  ;;  %v873_v51 = vld [vmem:[#allocation9 + $0x4b0] sm:$0xff] }
 0x178   : > { %v498_v55 = vpop.f32.mrf.mxu0  ;;  %v1035_v50 = vld [vmem:[#allocation9 + $0x678] sm:$0xff] }
 0x179   : > { %528 = vst [vmem:[#allocation2 + $0x28] sm:$0xfc] %v516_v52  ;;  %v517_v56 = vrot.slane %v502_v53, 6  ;;  %v503_v57 = vmax.f32 %v497_v54, 0.0  ;;  %v499_v58 = vadd.f32 %v498_v55, %v421_v45  ;;  %v1037_v45 = vld [vmem:[#allocation9 + $0x688] sm:$0xff]  ;;  %v871_v55 = vld [vmem:[#allocation9 + $0x4a0] sm:$0xff] }
 0x17a   : > { %v872_v53 = vld [vmem:[#allocation9 + $0x4a8] sm:$0xff] }
 0x17b   : > { %529 = vst [vmem:[#allocation2 + $0x10] sm:$0xfc] %v517_v56  ;;  %v518_v59 = vrot.slane %v503_v57, 6  ;;  %v504_v60 = vmax.f32 %v499_v58, 0.0  ;;  %v1033_v54 = vld [vmem:[#allocation9 + $0x668] sm:$0xff]  ;;  %v870_v57 = vld [vmem:[#allocation9 + $0x498] sm:$0xff] }
 0x17c   : > { %v1031_v58 = vld [vmem:[#allocation9 + $0x658] sm:$0xff] }
 0x17d   : > { %v2323_v61 = vsel %vm515_vm0, %v516_v52, %v518_v59  ;;  %532 = vst [vmem:[#allocation2 + $0x18] sm:$0x3] %v518_v59  ;;  %v520_v62 = vrot.slane %v504_v60, 6  ;;  %v1034_v52 = vld [vmem:[#allocation9 + $0x670] sm:$0xff] }
 0x17e   : > { %530 = vst [vmem:[#allocation2 + $0x8] sm:$0xff] %v2323_v61  ;;  %v679_v13 = vrot.slane %v2323_v61, 1  ;;  %v869_v59 = vld [vmem:[#allocation9 + $0x490] sm:$0xff] }
 0x17f   : > { %v2326_v63 = vsel %vm515_vm0, %v517_v56, %v520_v62  ;;  %533 = vst [vmem:[#allocation2 + $0x20] sm:$0x3] %v520_v62  ;;  %v1032_v56 = vld [vmem:[#allocation9 + $0x660] sm:$0xff]  ;;  %v1030_v60 = vld [vmem:[#allocation9 + $0x650] sm:$0xff]  ;;  %v868_v62 = vld [vmem:[#allocation9 + $0x488] sm:$0xff] }
 0x180   : > { %v602_v1 = vld [vmem:[#allocation2 + $0x28] sm:$0xfe]  ;;  %v682_v10 = vrot.slane %v2326_v63, 1  ;;  %v1093_v17 = vrot.slane %v2326_v63, 3  ;;  %v924_v44 = vrot.slane %v2326_v63, 2 }
 0x181   : > { %v678_v6 = vrot.slane %v602_v1, 1  ;;  %v534_v7 = vld [vmem:[#allocation2 + $0x28] sm:$0xff]  ;;  %v1029_v1 = vld [vmem:[#allocation9 + $0x648] sm:$0xff] }
 0x182   : > { %v535_v3 = vld [vmem:[#allocation2 + $0x10] sm:$0xff] }
 0x183   : > { %v603_v4 = vld [vmem:[#allocation2 + $0x10] sm:$0xfe]  ;;  %833 = vmatprep.mubr.f32.mxu0 %v535_v3  ;;  %v680_v18 = vsel %vm677_vm1, %v678_v6, %v679_v13  ;;  %v865_v6 = vld [vmem:[#allocation9 + $0x470] sm:$0xff] }
 0x184   : > { %v1016_v5 = vld [vmem:[#allocation2 + $0x10] sm:$0xf8]  ;;  %v681_v9 = vrot.slane %v603_v4, 1  ;;  %834 = vmatmul.mubr.f32.vlgmr.msra.gmra.mxu0 %v534_v7  ;;  %v604_v23 = vld [vmem:[#allocation2 + $0x18] sm:$0x1]  ;;  %v866_v4 = vld [vmem:[#allocation9 + $0x478] sm:$0xff] }
 0x185   : > { %v1092_v12 = vrot.slane %v1016_v5, 3  ;;  %1104 = vmatpush1.msra.mxu0 %v1050_v2  ;;  %839 = vmatprep.mubr.f32.mxu0 %v2326_v63  ;;  %v684_v31 = vrot.slane %v604_v23, 1  ;;  %v847_v32 = vld [vmem:[#allocation2 + $0x10] sm:$0xfc]  ;;  %v1027_v5 = vld [vmem:[#allocation9 + $0x638] sm:$0xff]  ;;  %v1026_v7 = vld [vmem:[#allocation9 + $0x630] sm:$0xff] }
 0x186   : > { %v683_v15 = vsel %vm677_vm1, %v681_v9, %v682_v10  ;;  %1105 = vmatprep.subr.mxu0 %v1049_v8  ;;  %v605_v19 = vld [vmem:[#allocation2 + $0x20] sm:$0x1]  ;;  %v923_v38 = vrot.slane %v847_v32, 2  ;;  %v867_v2 = vld [vmem:[#allocation9 + $0x480] sm:$0xff]  ;;  %v857_v23 = vld [vmem:[#allocation9 + $0x430] sm:$0xff] }
 0x187   : > { %756 = vmatprep.mubr.f32.mxu1 %v683_v15  ;;  %1106 = vmatpush1.msra.mxu0 %v1048_v11  ;;  %v686_v22 = vrot.slane %v605_v19, 1  ;;  %v1094_v25 = vsel %vm1088_vm2, %v1092_v12, %v1093_v17  ;;  %v685_v39 = vsel %vm677_vm1, %v679_v13, %v684_v31  ;;  %v1028_v3 = vld [vmem:[#allocation9 + $0x640] sm:$0xff]  ;;  %v864_v8 = vld [vmem:[#allocation9 + $0x468] sm:$0xff]  ;;  %v862_v12 = vld [vmem:[#allocation9 + $0x458] sm:$0xff] }
 0x188   : > { %757 = vmatmul.mubr.f32.vlgmr.msra.gmra.mxu1 %v680_v18  ;;  %1107 = vmatprep.subr.mxu0 %v1047_v14  ;;  %v925_v48 = vsel %vm919_vm3, %v923_v38, %v924_v44  ;;  %v1025_v9 = vld [vmem:[#allocation9 + $0x628] sm:$0xff]  ;;  %v1024_v11 = vld [vmem:[#allocation9 + $0x620] sm:$0xff]  ;;  %v1023_v13 = vld [vmem:[#allocation9 + $0x618] sm:$0xff] }
 0x189   : > { %840 = vmatmul.mubr.f32.gmra.mxu0 %v2323_v61  ;;  %v687_v27 = vsel %vm677_vm1, %v682_v10, %v686_v22  ;;  %935 = vmatpush1.msra.mxu1 %v881_v21  ;;  %v863_v10 = vld [vmem:[#allocation9 + $0x460] sm:$0xff]  ;;  %v861_v14 = vld [vmem:[#allocation9 + $0x450] sm:$0xff]  ;;  %v1021_v18 = vld [vmem:[#allocation9 + $0x608] sm:$0xff] }
 0x18a   : > { %1108 = vmatpush1.msra.mxu0 %v1046_v16  ;;  %1167 = vmatprep.mubr.f32.mxu0 %v1094_v25  ;;  %v1022_v15 = vld [vmem:[#allocation9 + $0x610] sm:$0xff]  ;;  %v860_v16 = vld [vmem:[#allocation9 + $0x448] sm:$0xff]  ;;  %v859_v19 = vld [vmem:[#allocation9 + $0x440] sm:$0xff] }
 0x18b   : > { %1109 = vmatprep.subr.mxu0 %v1045_v20  ;;  %762 = vmatprep.mubr.f32.mxu1 %v687_v27  ;;  %v1020_v20 = vld [vmem:[#allocation9 + $0x600] sm:$0xff]  ;;  %v858_v21 = vld [vmem:[#allocation9 + $0x438] sm:$0xff]  ;;  %v856_v25 = vld [vmem:[#allocation9 + $0x428] sm:$0xff] }
 0x18c   : > { %1110 = vmatpush1.msra.mxu0 %v1044_v24  ;;  %936 = vmatprep.subr.mxu1 %v880_v28  ;;  %v1083_v22 = vld [vmem:[#allocation9 + $0x7f8] sm:$0xff]  ;;  %v1082_v24 = vld [vmem:[#allocation9 + $0x7f0] sm:$0xff]  ;;  %v855_v27 = vld [vmem:[#allocation9 + $0x420] sm:$0xff] }
 0x18d   : > { %1111 = vmatprep.subr.mxu0 %v1043_v26  ;;  %937 = vmatpush1.msra.mxu1 %v879_v30  ;;  %v1081_v26 = vld [vmem:[#allocation9 + $0x7e8] sm:$0xff]  ;;  %v1080_v28 = vld [vmem:[#allocation9 + $0x7e0] sm:$0xff]  ;;  %v1079_v30 = vld [vmem:[#allocation9 + $0x7d8] sm:$0xff] }
 0x18e   : > { %1112 = vmatpush1.msra.mxu0 %v1042_v29  ;;  %938 = vmatprep.subr.mxu1 %v878_v34  ;;  %v854_v29 = vld [vmem:[#allocation9 + $0x418] sm:$0xff]  ;;  %v853_v31 = vld [vmem:[#allocation9 + $0x410] sm:$0xff]  ;;  %v1077_v34 = vld [vmem:[#allocation9 + $0x7c8] sm:$0xff] }
 0x18f   : > { %1113 = vmatprep.subr.mxu0 %v1041_v33  ;;  %763 = vmatmul.mubr.f32.gmra.mxu1 %v685_v39  ;;  %v1078_v32 = vld [vmem:[#allocation9 + $0x7d0] sm:$0xff]  ;;  %v852_v33 = vld [vmem:[#allocation9 + $0x408] sm:$0xff]  ;;  %v1075_v38 = vld [vmem:[#allocation9 + $0x7b8] sm:$0xff] }
 0x190   : > { %1114 = vmatpush1.msra.mxu0 %v1040_v35  ;;  %939 = vmatpush1.msra.mxu1 %v877_v37  ;;  %v851_v35 = vld [vmem:[#allocation9 + $0x400] sm:$0xff]  ;;  %v914_v37 = vld [vmem:[#allocation9 + $0x5f8] sm:$0xff]  ;;  %v913_v39 = vld [vmem:[#allocation9 + $0x5f0] sm:$0xff] }
 0x191   : > { %1115 = vmatprep.subr.mxu0 %v1039_v36  ;;  %940 = vmatprep.subr.mxu1 %v876_v42  ;;  %v1076_v36 = vld [vmem:[#allocation9 + $0x7c0] sm:$0xff]  ;;  %v912_v42 = vld [vmem:[#allocation9 + $0x5e8] sm:$0xff] }
 0x192   : > { %1116 = vmatpush1.msra.mxu0 %v1038_v40  ;;  %998 = vmatprep.mubr.f32.mxu1 %v925_v48  ;;  %v1074_v40 = vld [vmem:[#allocation9 + $0x7b0] sm:$0xff]  ;;  %v910_v48 = vld [vmem:[#allocation9 + $0x5d8] sm:$0xff] }
 0x193   : > { %1117 = vmatprep.subr.mxu0 %v1037_v45  ;;  %941 = vmatpush1.msra.mxu1 %v875_v46  ;;  %v1073_v45 = vld [vmem:[#allocation9 + $0x7a8] sm:$0xff]  ;;  %v911_v46 = vld [vmem:[#allocation9 + $0x5e0] sm:$0xff] }
 0x194   : > { %1118 = vmatpush1.msra.mxu0 %v1036_v47  ;;  %942 = vmatprep.subr.mxu1 %v874_v49  ;;  %v1072_v47 = vld [vmem:[#allocation9 + $0x7a0] sm:$0xff]  ;;  %v1071_v49 = vld [vmem:[#allocation9 + $0x798] sm:$0xff] }
 0x195   : > { %1119 = vmatprep.subr.mxu0 %v1035_v50  ;;  %943 = vmatpush1.msra.mxu1 %v873_v51  ;;  %v909_v50 = vld [vmem:[#allocation9 + $0x5d0] sm:$0xff] }
 0x196   : > { %1120 = vmatpush1.msra.mxu0 %v1034_v52  ;;  %944 = vmatprep.subr.mxu1 %v872_v53  ;;  %v1070_v51 = vld [vmem:[#allocation9 + $0x790] sm:$0xff]  ;;  %v908_v52 = vld [vmem:[#allocation9 + $0x5c8] sm:$0xff] }
 0x197   : > { %1121 = vmatprep.subr.mxu0 %v1033_v54  ;;  %945 = vmatpush1.msra.mxu1 %v871_v55  ;;  %v1069_v53 = vld [vmem:[#allocation9 + $0x788] sm:$0xff]  ;;  %v907_v54 = vld [vmem:[#allocation9 + $0x5c0] sm:$0xff] }
 0x198   : > { %1122 = vmatpush1.msra.mxu0 %v1032_v56  ;;  %946 = vmatprep.subr.mxu1 %v870_v57  ;;  %v1068_v55 = vld [vmem:[#allocation9 + $0x780] sm:$0xff]  ;;  %v906_v56 = vld [vmem:[#allocation9 + $0x5b8] sm:$0xff] }
 0x199   : > { %1123 = vmatprep.subr.mxu0 %v1031_v58  ;;  %947 = vmatpush1.msra.mxu1 %v869_v59  ;;  %v1067_v57 = vld [vmem:[#allocation9 + $0x778] sm:$0xff]  ;;  %v905_v58 = vld [vmem:[#allocation9 + $0x5b0] sm:$0xff] }
 0x19a   : > { %1124 = vmatpush1.msra.mxu0 %v1030_v60  ;;  %948 = vmatprep.subr.mxu1 %v868_v62  ;;  %v1066_v59 = vld [vmem:[#allocation9 + $0x770] sm:$0xff]  ;;  %v904_v60 = vld [vmem:[#allocation9 + $0x5a8] sm:$0xff] }
 0x19b   : > { %1125 = vmatprep.subr.mxu0 %v1029_v1  ;;  %949 = vmatpush1.msra.mxu1 %v867_v2  ;;  %v1065_v62 = vld [vmem:[#allocation9 + $0x768] sm:$0xff]  ;;  %v903_v1 = vld [vmem:[#allocation9 + $0x5a0] sm:$0xff] }
 0x19c   : > { %1126 = vmatpush1.msra.mxu0 %v1028_v3  ;;  %950 = vmatprep.subr.mxu1 %v866_v4  ;;  %v1064_v2 = vld [vmem:[#allocation9 + $0x760] sm:$0xff]  ;;  %v902_v3 = vld [vmem:[#allocation9 + $0x598] sm:$0xff] }
 0x19d   : > { %1127 = vmatprep.subr.mxu0 %v1027_v5  ;;  %951 = vmatpush1.msra.mxu1 %v865_v6  ;;  %v1063_v4 = vld [vmem:[#allocation9 + $0x758] sm:$0xff]  ;;  %v901_v5 = vld [vmem:[#allocation9 + $0x590] sm:$0xff] }
 0x19e   : > { %1128 = vmatpush1.msra.mxu0 %v1026_v7  ;;  %952 = vmatprep.subr.mxu1 %v864_v8  ;;  %v1062_v6 = vld [vmem:[#allocation9 + $0x750] sm:$0xff]  ;;  %v900_v7 = vld [vmem:[#allocation9 + $0x588] sm:$0xff] }
 0x19f   : > { %1129 = vmatprep.subr.mxu0 %v1025_v9  ;;  %953 = vmatpush1.msra.mxu1 %v863_v10  ;;  %v1061_v8 = vld [vmem:[#allocation9 + $0x748] sm:$0xff]  ;;  %v899_v9 = vld [vmem:[#allocation9 + $0x580] sm:$0xff] }
 0x1a0   : > { %1130 = vmatpush1.msra.mxu0 %v1024_v11  ;;  %954 = vmatprep.subr.mxu1 %v862_v12  ;;  %v1060_v10 = vld [vmem:[#allocation9 + $0x740] sm:$0xff]  ;;  %v898_v11 = vld [vmem:[#allocation9 + $0x578] sm:$0xff] }
 0x1a1   : > { %1131 = vmatprep.subr.mxu0 %v1023_v13  ;;  %955 = vmatpush1.msra.mxu1 %v861_v14  ;;  %v1059_v12 = vld [vmem:[#allocation9 + $0x738] sm:$0xff]  ;;  %v897_v13 = vld [vmem:[#allocation9 + $0x570] sm:$0xff] }
 0x1a2   : > { %1132 = vmatpush1.msra.mxu0 %v1022_v15  ;;  %956 = vmatprep.subr.mxu1 %v860_v16  ;;  %v1058_v14 = vld [vmem:[#allocation9 + $0x730] sm:$0xff]  ;;  %v896_v15 = vld [vmem:[#allocation9 + $0x568] sm:$0xff] }
 0x1a3   : > { %1133 = vmatprep.subr.mxu0 %v1021_v18  ;;  %957 = vmatpush1.msra.mxu1 %v859_v19  ;;  %v1057_v16 = vld [vmem:[#allocation9 + $0x728] sm:$0xff]  ;;  %v895_v18 = vld [vmem:[#allocation9 + $0x560] sm:$0xff] }
 0x1a4   : > { %1134 = vmatpush1.msra.mxu0 %v1020_v20  ;;  %958 = vmatprep.subr.mxu1 %v858_v21  ;;  %v1056_v19 = vld [vmem:[#allocation9 + $0x720] sm:$0xff]  ;;  %v1015_v20 = vld [vmem:[#allocation2 + $0x28] sm:$0xf8] }
 0x1a5   : > { %1135 = vmatprep.subr.mxu0 %v1083_v22  ;;  %959 = vmatpush1.msra.mxu1 %v857_v23  ;;  %v894_v21 = vld [vmem:[#allocation9 + $0x558] sm:$0xff]  ;;  %v1018_v23 = vld [vmem:[#allocation2 + $0x20] sm:$0x7] }
 0x1a6   : > { %1136 = vmatpush2.msra.mxu0 %v1082_v24  ;;  %960 = vmatprep.subr.mxu1 %v856_v25  ;;  %v1055_v22 = vld [vmem:[#allocation9 + $0x718] sm:$0xff]  ;;  %v893_v24 = vld [vmem:[#allocation9 + $0x550] sm:$0xff] }
 0x1a7   : > { %1137 = vmatprep.subr.mxu0 %v1081_v26  ;;  %961 = vmatpush1.msra.mxu1 %v855_v27  ;;  %v1054_v25 = vld [vmem:[#allocation9 + $0x710] sm:$0xff]  ;;  %v892_v26 = vld [vmem:[#allocation9 + $0x548] sm:$0xff] }
 0x1a8   : > { %1138 = vmatpush2.msra.mxu0 %v1080_v28  ;;  %962 = vmatprep.subr.mxu1 %v854_v29  ;;  %v1053_v27 = vld [vmem:[#allocation9 + $0x708] sm:$0xff]  ;;  %v1089_v28 = vrot.slane %v1015_v20, 3  ;;  %v891_v29 = vld [vmem:[#allocation9 + $0x540] sm:$0xff] }
 0x1a9   : > { %1139 = vmatprep.subr.mxu0 %v1079_v30  ;;  %963 = vmatpush1.msra.mxu1 %v853_v31  ;;  %v1052_v30 = vld [vmem:[#allocation9 + $0x700] sm:$0xff]  ;;  %v1097_v31 = vrot.slane %v1018_v23, 3  ;;  %v1390_v20 = vld [vmem:[#allocation12 + $0xa8] sm:$0xff] }
 0x1aa   : > { %1140 = vmatpush2.msra.mxu0 %v1078_v32  ;;  %964 = vmatprep.subr.mxu1 %v852_v33  ;;  %v1017_v32 = vld [vmem:[#allocation2 + $0x18] sm:$0x7]  ;;  %v890_v33 = vld [vmem:[#allocation9 + $0x538] sm:$0xff] }
 0x1ab   : > { %1141 = vmatprep.subr.mxu0 %v1077_v34  ;;  %965 = vmatpush1.msra.mxu1 %v851_v35  ;;  %v1090_v34 = vrot.slane %v2323_v61, 3  ;;  %v889_v35 = vld [vmem:[#allocation9 + $0x530] sm:$0xff]  ;;  %v1209_v23 = vld [vmem:[#allocation9 + $0x8a0] sm:$0xff] }
 0x1ac   : > { %1142 = vmatpush2.msra.mxu0 %v1076_v36  ;;  %966 = vmatprep.subr.mxu1 %v914_v37  ;;  %v888_v37 = vld [vmem:[#allocation9 + $0x528] sm:$0xff] }
 0x1ad   : > { %1143 = vmatprep.subr.mxu0 %v1075_v38  ;;  %967 = vmatpush2.msra.mxu1 %v913_v39  ;;  %v1091_v36 = vsel %vm1088_vm2, %v1089_v28, %v1090_v34  ;;  %v1095_v38 = vrot.slane %v1017_v32, 3  ;;  %v1400_v39 = vld [vmem:[#allocation12 + $0xf8] sm:$0xff]  ;;  %v1386_v28 = vld [vmem:[#allocation12 + $0x88] sm:$0xff] }
 0x1ae   : > { %1144 = vmatpush2.msra.mxu0 %v1074_v40  ;;  %968 = vmatprep.subr.mxu1 %v912_v42  ;;  %v1098_v40 = vsel %vm1088_vm2, %v1093_v17, %v1097_v31  ;;  %v887_v42 = vld [vmem:[#allocation9 + $0x520] sm:$0xff] }
 0x1af   : > { %1145 = vmatprep.subr.mxu0 %v1073_v45  ;;  %969 = vmatpush2.msra.mxu1 %v911_v46  ;;  %v846_v45 = vld [vmem:[#allocation2 + $0x28] sm:$0xfc]  ;;  %v883_v17 = vld [vmem:[#allocation9 + $0x500] sm:$0xff] }
 0x1b0   : > { %1146 = vmatpush2.msra.mxu0 %v1072_v47  ;;  %970 = vmatprep.subr.mxu1 %v910_v48  ;;  %v1399_v46 = vld [vmem:[#allocation12 + $0xf0] sm:$0xff]  ;;  %v849_v48 = vld [vmem:[#allocation2 + $0x20] sm:$0x3]  ;;  %v1205_v31 = vld [vmem:[#allocation9 + $0x880] sm:$0xff] }
 0x1b1   : > { %1147 = vmatprep.subr.mxu0 %v1071_v49  ;;  %971 = vmatpush2.msra.mxu1 %v909_v50  ;;  %v886_v47 = vld [vmem:[#allocation9 + $0x518] sm:$0xff]  ;;  %v885_v49 = vld [vmem:[#allocation9 + $0x510] sm:$0xff] }
 0x1b2   : > { %1148 = vmatpush2.msra.mxu0 %v1070_v51  ;;  %972 = vmatprep.subr.mxu1 %v908_v52  ;;  %v1398_v50 = vld [vmem:[#allocation12 + $0xe8] sm:$0xff]  ;;  %v1096_v51 = vsel %vm1088_vm2, %v1090_v34, %v1095_v38  ;;  %v1384_v32 = vld [vmem:[#allocation12 + $0x78] sm:$0xff]  ;;  %v1383_v34 = vld [vmem:[#allocation12 + $0x70] sm:$0xff] }
 0x1b3   : > { %1149 = vmatprep.subr.mxu0 %v1069_v53  ;;  %973 = vmatpush2.msra.mxu1 %v907_v54  ;;  %v884_v52 = vld [vmem:[#allocation9 + $0x508] sm:$0xff]  ;;  %v920_v53 = vrot.slane %v846_v45, 2  ;;  %v1379_v45 = vld [vmem:[#allocation12 + $0x50] sm:$0xff] }
 0x1b4   : > { %1150 = vmatpush2.msra.mxu0 %v1068_v55  ;;  %974 = vmatprep.subr.mxu1 %v906_v56  ;;  %v1397_v54 = vld [vmem:[#allocation12 + $0xe0] sm:$0xff]  ;;  %v928_v55 = vrot.slane %v849_v48, 2 }
 0x1b5   : > { %1151 = vmatprep.subr.mxu0 %v1067_v57  ;;  %975 = vmatpush2.msra.mxu1 %v905_v58  ;;  %v848_v56 = vld [vmem:[#allocation2 + $0x18] sm:$0x3]  ;;  %v1396_v57 = vld [vmem:[#allocation12 + $0xd8] sm:$0xff]  ;;  %v921_v58 = vrot.slane %v2323_v61, 2  ;;  %v1198_v48 = vld [vmem:[#allocation9 + $0x848] sm:$0xff] }
 0x1b6   : > { %1152 = vmatpush2.msra.mxu0 %v1066_v59  ;;  %976 = vmatprep.subr.mxu1 %v904_v60  ;;  %v1220_v59 = vld [vmem:[#allocation9 + $0x8f8] sm:$0xff]  ;;  %v1185_v60 = vld [vmem:[#allocation2 + $0x10] sm:$0xf0] }
 0x1b7   : > { %1153 = vmatprep.subr.mxu0 %v1065_v62  ;;  %977 = vmatpush2.msra.mxu1 %v903_v1  ;;  %v1219_v62 = vld [vmem:[#allocation9 + $0x8f0] sm:$0xff]  ;;  %v922_v1 = vsel %vm919_vm3, %v920_v53, %v921_v58  ;;  %v1217_v61 = vld [vmem:[#allocation9 + $0x8e0] sm:$0xff] }
 0x1b8   : > { %1154 = vmatpush2.msra.mxu0 %v1064_v2  ;;  %978 = vmatprep.subr.mxu1 %v902_v3  ;;  %v1218_v2 = vld [vmem:[#allocation9 + $0x8e8] sm:$0xff]  ;;  %v926_v3 = vrot.slane %v848_v56, 2  ;;  %v1375_v53 = vld [vmem:[#allocation12 + $0x30] sm:$0xff] }
 0x1b9   : > { %1155 = vmatprep.subr.mxu0 %v1063_v4  ;;  %979 = vmatpush2.msra.mxu1 %v901_v5  ;;  %v1395_v4 = vld [vmem:[#allocation12 + $0xd0] sm:$0xff]  ;;  %v929_v5 = vsel %vm919_vm3, %v924_v44, %v928_v55  ;;  %v1381_v38 = vld [vmem:[#allocation12 + $0x60] sm:$0xff] }
 0x1ba   : > { %1156 = vmatpush2.msra.mxu0 %v1062_v6  ;;  %980 = vmatprep.subr.mxu1 %v900_v7  ;;  %v1261_v6 = vrot.slane %v1185_v60, 4  ;;  %v1394_v7 = vld [vmem:[#allocation12 + $0xc8] sm:$0xff]  ;;  %v1373_v56 = vld [vmem:[#allocation12 + $0x20] sm:$0xff]  ;;  %v1371_v60 = vld [vmem:[#allocation12 + $0x10] sm:$0xff] }
 0x1bb   : > { %1157 = vmatprep.subr.mxu0 %v1061_v8  ;;  %981 = vmatpush2.msra.mxu1 %v899_v9  ;;  %v1216_v8 = vld [vmem:[#allocation9 + $0x8d8] sm:$0xff]  ;;  %v1215_v9 = vld [vmem:[#allocation9 + $0x8d0] sm:$0xff]  ;;  %v1194_v55 = vld [vmem:[#allocation9 + $0x828] sm:$0xff] }
 0x1bc   : > { %1158 = vmatpush2.msra.mxu0 %v1060_v10  ;;  %982 = vmatprep.subr.mxu1 %v898_v11  ;;  %v1262_v10 = vrot.slane %v2326_v63, 4  ;;  %v927_v11 = vsel %vm919_vm3, %v921_v58, %v926_v3  ;;  %v1372_v58 = vld [vmem:[#allocation12 + $0x18] sm:$0xff]  ;;  %v1369_v3 = vld [vmem:[#allocation12] sm:$0xff] }
 0x1bd   : > { %1159 = vmatprep.subr.mxu0 %v1059_v12  ;;  %983 = vmatpush2.msra.mxu1 %v897_v13  ;;  %v1214_v12 = vld [vmem:[#allocation9 + $0x8c8] sm:$0xff] }
 0x1be   : > { %1160 = vmatpush2.msra.mxu0 %v1058_v14  ;;  %984 = vmatprep.subr.mxu1 %v896_v15  ;;  %v1393_v13 = vld [vmem:[#allocation12 + $0xc0] sm:$0xff]  ;;  %v1263_v44 = vsel %vm1257_vm4, %v1261_v6, %v1262_v10  ;;  %v1392_v15 = vld [vmem:[#allocation12 + $0xb8] sm:$0xff] }
 0x1bf   : > { %1161 = vmatprep.subr.mxu0 %v1057_v16  ;;  %985 = vmatpush2.msra.mxu1 %v895_v18  ;;  %v1213_v14 = vld [vmem:[#allocation9 + $0x8c0] sm:$0xff]  ;;  %v1212_v16 = vld [vmem:[#allocation9 + $0x8b8] sm:$0xff]  ;;  %v1250_v6 = vld [vmem:[#allocation9 + $0x9e8] sm:$0xff] }
 0x1c0   : > { %1162 = vmatpush2.msra.mxu0 %v1056_v19  ;;  %986 = vmatprep.subr.mxu1 %v894_v21  ;;  %v1391_v18 = vld [vmem:[#allocation12 + $0xb0] sm:$0xff]  ;;  %v1210_v21 = vld [vmem:[#allocation9 + $0x8a8] sm:$0xff] }
 0x1c1   : > { %1163 = vmatprep.subr.mxu0 %v1055_v22  ;;  %987 = vmatpush2.msra.mxu1 %v893_v24  ;;  %v1211_v19 = vld [vmem:[#allocation9 + $0x8b0] sm:$0xff]  ;;  %v1389_v22 = vld [vmem:[#allocation12 + $0xa0] sm:$0xff]  ;;  %v1388_v24 = vld [vmem:[#allocation12 + $0x98] sm:$0xff] }
 0x1c2   : > { %1164 = vmatpush2.msra.mxu0 %v1054_v25  ;;  %988 = vmatprep.subr.mxu1 %v892_v26  ;;  %v1208_v25 = vld [vmem:[#allocation9 + $0x898] sm:$0xff] }
 0x1c3   : > { %1165 = vmatprep.subr.mxu0 %v1053_v27  ;;  %989 = vmatpush2.msra.mxu1 %v891_v29  ;;  %v1387_v26 = vld [vmem:[#allocation12 + $0x90] sm:$0xff]  ;;  %v1206_v29 = vld [vmem:[#allocation9 + $0x888] sm:$0xff] }
 0x1c4   : > { %1166 = vmatpush2.msra.mxu0 %v1052_v30  ;;  %990 = vmatprep.subr.mxu1 %v890_v33  ;;  %v1207_v27 = vld [vmem:[#allocation9 + $0x890] sm:$0xff]  ;;  %v1385_v30 = vld [vmem:[#allocation12 + $0x80] sm:$0xff]  ;;  %v1204_v33 = vld [vmem:[#allocation9 + $0x878] sm:$0xff] }
 0x1c5   : > { %1168 = vmatmul.mubr.f32.vlgmr.msra.gmra.mxu0 %v1091_v36  ;;  %991 = vmatpush2.msra.mxu1 %v889_v35  ;;  %v1203_v35 = vld [vmem:[#allocation9 + $0x870] sm:$0xff] }
 0x1c6   : > { %1173 = vmatprep.mubr.f32.mxu0 %v1098_v40  ;;  %992 = vmatprep.subr.mxu1 %v888_v37  ;;  %v1382_v36 = vld [vmem:[#allocation12 + $0x68] sm:$0xff]  ;;  %v1380_v40 = vld [vmem:[#allocation12 + $0x58] sm:$0xff] }
 0x1c7   : > { %1401 = vmatprep.subr.mxu0 %v1400_v39  ;;  %993 = vmatpush2.msra.mxu1 %v887_v42  ;;  %v1202_v37 = vld [vmem:[#allocation9 + $0x868] sm:$0xff]  ;;  %v1201_v39 = vld [vmem:[#allocation9 + $0x860] sm:$0xff]  ;;  %v1200_v42 = vld [vmem:[#allocation9 + $0x858] sm:$0xff] }
 0x1c8   : > { %1402 = vmatpush1.msra.mxu0 %v1399_v46  ;;  %994 = vmatprep.subr.mxu1 %v886_v47  ;;  %v1199_v46 = vld [vmem:[#allocation9 + $0x850] sm:$0xff] }
 0x1c9   : > { %1174 = vmatmul.mubr.f32.gmra.mxu0 %v1096_v51  ;;  %995 = vmatpush2.msra.mxu1 %v885_v49  ;;  %v1378_v47 = vld [vmem:[#allocation12 + $0x48] sm:$0xff]  ;;  %v1377_v49 = vld [vmem:[#allocation12 + $0x40] sm:$0xff]  ;;  %v1376_v51 = vld [vmem:[#allocation12 + $0x38] sm:$0xff] }
 0x1ca   : > { %1403 = vmatprep.subr.mxu0 %v1398_v50  ;;  %996 = vmatprep.subr.mxu1 %v884_v52  ;;  %v1197_v50 = vld [vmem:[#allocation9 + $0x840] sm:$0xff]  ;;  %v1196_v52 = vld [vmem:[#allocation9 + $0x838] sm:$0xff] }
 0x1cb   : > { %1404 = vmatpush1.msra.mxu0 %v1397_v54  ;;  %997 = vmatpush2.msra.mxu1 %v883_v17  ;;  %v1195_v54 = vld [vmem:[#allocation9 + $0x830] sm:$0xff] }
 0x1cc   : > { %1405 = vmatprep.subr.mxu0 %v1396_v57  ;;  %999 = vmatmul.mubr.f32.vlgmr.msra.gmra.mxu1 %v922_v1  ;;  %v1374_v17 = vld [vmem:[#allocation12 + $0x28] sm:$0xff]  ;;  %v1193_v57 = vld [vmem:[#allocation9 + $0x820] sm:$0xff] }
 0x1cd   : > { %1272 = vmatprep.subr.mxu1 %v1220_v59  ;;  %1004 = vmatprep.mubr.f32.mxu1 %v929_v5  ;;  %v1192_v59 = vld [vmem:[#allocation9 + $0x818] sm:$0xff]  ;;  %v1370_v1 = vld [vmem:[#allocation12 + $0x8] sm:$0xff] }
 0x1ce   : > { %1273 = vmatpush1.msra.mxu1 %v1219_v62  ;;  %1406 = vmatpush1.msra.mxu0 %v1395_v4  ;;  %v1191_v62 = vld [vmem:[#allocation9 + $0x810] sm:$0xff]  ;;  %v1189_v4 = vld [vmem:[#allocation9 + $0x800] sm:$0xff]  ;;  %v1252_v5 = vld [vmem:[#allocation9 + $0x9f8] sm:$0xff] }
 0x1cf   : > { %1274 = vmatprep.subr.mxu1 %v1218_v2  ;;  %1407 = vmatprep.subr.mxu0 %v1394_v7  ;;  %v1190_v2 = vld [vmem:[#allocation9 + $0x808] sm:$0xff]  ;;  %v1249_v7 = vld [vmem:[#allocation9 + $0x9e0] sm:$0xff] }
 0x1d0   : > { %1275 = vmatpush1.msra.mxu1 %v1217_v61  ;;  %1408 = vmatpush1.msra.mxu0 %v1393_v13  ;;  %v1251_v61 = vld [vmem:[#allocation9 + $0x9f0] sm:$0xff]  ;;  %v1245_v13 = vld [vmem:[#allocation9 + $0x9c0] sm:$0xff] }
 0x1d1   : > { %1005 = vmatmul.mubr.f32.gmra.mxu1 %v927_v11  ;;  %1276 = vmatprep.subr.mxu1 %v1216_v8  ;;  %v1792_v8 = vld [vmem:[%s2291_s28] sm:$0xff] }
 0x1d2   : > { %1277 = vmatpush1.msra.mxu1 %v1215_v9  ;;  %1336 = vmatprep.mubr.f32.mxu1 %v1263_v44  ;;  %v1248_v9 = vld [vmem:[#allocation9 + $0x9d8] sm:$0xff]  ;;  %v1247_v11 = vld [vmem:[#allocation9 + $0x9d0] sm:$0xff] }
 0x1d3   : > { %1278 = vmatprep.subr.mxu1 %v1214_v12  ;;  %1409 = vmatprep.subr.mxu0 %v1392_v15  ;;  %v1246_v12 = vld [vmem:[#allocation9 + $0x9c8] sm:$0xff]  ;;  %v1243_v15 = vld [vmem:[#allocation9 + $0x9b0] sm:$0xff] }
 0x1d4   : > { %1279 = vmatpush1.msra.mxu1 %v1213_v14  ;;  %1410 = vmatpush1.msra.mxu0 %v1391_v18  ;;  %v1793_v44 = vld [vmem:[%s2291_s28 + $0x8] sm:$0xff] }
 0x1d5   : > { %1280 = vmatprep.subr.mxu1 %v1212_v16  ;;  %1411 = vmatprep.subr.mxu0 %v1390_v20  ;;  %v1244_v14 = vld [vmem:[#allocation9 + $0x9b8] sm:$0xff]  ;;  %v1242_v16 = vld [vmem:[#allocation9 + $0x9a8] sm:$0xff]  ;;  %v1241_v18 = vld [vmem:[#allocation9 + $0x9a0] sm:$0xff] }
 0x1d6   : > { %1281 = vmatpush1.msra.mxu1 %v1211_v19  ;;  %1412 = vmatpush1.msra.mxu0 %v1389_v22  ;;  %v1240_v19 = vld [vmem:[#allocation9 + $0x998] sm:$0xff]  ;;  %v1238_v20 = vld [vmem:[#allocation9 + $0x988] sm:$0xff] }
 0x1d7   : > { %1282 = vmatprep.subr.mxu1 %v1210_v21  ;;  %1413 = vmatprep.subr.mxu0 %v1388_v24  ;;  %v1237_v21 = vld [vmem:[#allocation9 + $0x980] sm:$0xff]  ;;  %v1236_v22 = vld [vmem:[#allocation9 + $0x978] sm:$0xff]  ;;  %v1234_v24 = vld [vmem:[#allocation9 + $0x968] sm:$0xff] }
 0x1d8   : > { %1283 = vmatpush1.msra.mxu1 %v1209_v23  ;;  %1414 = vmatpush1.msra.mxu0 %v1387_v26  ;;  %v1235_v23 = vld [vmem:[#allocation9 + $0x970] sm:$0xff]  ;;  %v1232_v26 = vld [vmem:[#allocation9 + $0x958] sm:$0xff] }
 0x1d9   : > { %1284 = vmatprep.subr.mxu1 %v1208_v25  ;;  %1415 = vmatprep.subr.mxu0 %v1386_v28  ;;  %v1233_v25 = vld [vmem:[#allocation9 + $0x960] sm:$0xff]  ;;  %v1230_v28 = vld [vmem:[#allocation9 + $0x948] sm:$0xff] }
 0x1da   : > { %1285 = vmatpush1.msra.mxu1 %v1207_v27  ;;  %1416 = vmatpush1.msra.mxu0 %v1385_v30  ;;  %v1231_v27 = vld [vmem:[#allocation9 + $0x950] sm:$0xff]  ;;  %v1228_v30 = vld [vmem:[#allocation9 + $0x938] sm:$0xff] }
 0x1db   : > { %1286 = vmatprep.subr.mxu1 %v1206_v29  ;;  %1417 = vmatprep.subr.mxu0 %v1384_v32  ;;  %v1229_v29 = vld [vmem:[#allocation9 + $0x940] sm:$0xff]  ;;  %v1226_v32 = vld [vmem:[#allocation9 + $0x928] sm:$0xff] }
 0x1dc   : > { %1287 = vmatpush1.msra.mxu1 %v1205_v31  ;;  %1418 = vmatpush1.msra.mxu0 %v1383_v34  ;;  %v1227_v31 = vld [vmem:[#allocation9 + $0x930] sm:$0xff]  ;;  %v1184_v34 = vld [vmem:[#allocation2 + $0x28] sm:$0xf0] }
 0x1dd   : > { %1288 = vmatprep.subr.mxu1 %v1204_v33  ;;  %1419 = vmatprep.subr.mxu0 %v1382_v36  ;;  %v1225_v33 = vld [vmem:[#allocation9 + $0x920] sm:$0xff]  ;;  %v1187_v36 = vld [vmem:[#allocation2 + $0x20] sm:$0xf] }
 0x1de   : > { %1289 = vmatpush1.msra.mxu1 %v1203_v35  ;;  %1420 = vmatpush1.msra.mxu0 %v1381_v38  ;;  %v1224_v35 = vld [vmem:[#allocation9 + $0x918] sm:$0xff]  ;;  %v1222_v38 = vld [vmem:[#allocation9 + $0x908] sm:$0xff] }
 0x1df   : > { %1290 = vmatprep.subr.mxu1 %v1202_v37  ;;  %1421 = vmatprep.subr.mxu0 %v1380_v40  ;;  %v1223_v37 = vld [vmem:[#allocation9 + $0x910] sm:$0xff]  ;;  %v1221_v40 = vld [vmem:[#allocation9 + $0x900] sm:$0xff] }
 0x1e0   : > { %1291 = vmatpush1.msra.mxu1 %v1201_v39  ;;  %1422 = vmatpush1.msra.mxu0 %v1379_v45  ;;  %v1258_v39 = vrot.slane %v1184_v34, 4  ;;  %v1186_v45 = vld [vmem:[#allocation2 + $0x18] sm:$0xf] }
 0x1e1   : > { %1292 = vmatprep.subr.mxu1 %v1200_v42  ;;  %1423 = vmatprep.subr.mxu0 %v1378_v47  ;;  %v1266_v42 = vrot.slane %v1187_v36, 4 }
 0x1e2   : > { %1293 = vmatpush1.msra.mxu1 %v1199_v46  ;;  %1424 = vmatpush1.msra.mxu0 %v1377_v49  ;;  %v1794_v46 = vld [vmem:[#allocation2 + $0x8] sm:$0xff]  ;;  %v1264_v49 = vrot.slane %v1186_v45, 4 }
 0x1e3   : > { %1294 = vmatprep.subr.mxu1 %v1198_v48  ;;  %1425 = vmatprep.subr.mxu0 %v1376_v51  ;;  %v1259_v47 = vrot.slane %v1794_v46, 4 }
 0x1e4   : > { %1295 = vmatpush1.msra.mxu1 %v1197_v50  ;;  %1426 = vmatpush1.msra.mxu0 %v1375_v53  ;;  %v1267_v50 = vsel %vm1257_vm4, %v1262_v10, %v1266_v42 }
 0x1e5   : > { %1296 = vmatprep.subr.mxu1 %v1196_v52  ;;  %1427 = vmatprep.subr.mxu0 %v1374_v17  ;;  %v1260_v48 = vsel %vm1257_vm4, %v1258_v39, %v1259_v47  ;;  %v1265_v51 = vsel %vm1257_vm4, %v1259_v47, %v1264_v49 }
 0x1e6   : > { %1297 = vmatpush1.msra.mxu1 %v1195_v54  ;;  %1428 = vmatpush1.msra.mxu0 %v1373_v56 }
 0x1e7   : > { %1298 = vmatprep.subr.mxu1 %v1194_v55  ;;  %1429 = vmatprep.subr.mxu0 %v1372_v58 }
 0x1e8   : > { %1299 = vmatpush1.msra.mxu1 %v1193_v57  ;;  %1430 = vmatpush1.msra.mxu0 %v1371_v60 }
 0x1e9   : > { %1300 = vmatprep.subr.mxu1 %v1192_v59  ;;  %1431 = vmatprep.subr.mxu0 %v1370_v1 }
 0x1ea   : > { %1301 = vmatpush1.msra.mxu1 %v1191_v62  ;;  %1432 = vmatpush1.msra.mxu0 %v1369_v3 }
 0x1eb   : > { %1302 = vmatprep.subr.mxu1 %v1190_v2  ;;  %1465 = vmatprep.mubr.f32.mxu0 %v2068_v0 }
 0x1ec   : > { %1303 = vmatpush1.msra.mxu1 %v1189_v4  ;;  %1466 = vmatmul.mubr.f32.vlgmr.msra.gmra.mxu0 %v1792_v8 }
 0x1ed   : > { %1304 = vmatprep.subr.mxu1 %v1252_v5  ;;  %1471 = vmatprep.mubr.f32.mxu0 %v2068_v0  ;;  %v1239_v0 = vld [vmem:[#allocation9 + $0x990] sm:$0xff] }
 0x1ee   : > { %1305 = vmatpush2.msra.mxu1 %v1251_v61  ;;  %v1353_v61 = vld [vmem:[#allocation11] sm:$0x3] }
 0x1ef   : > { %1306 = vmatprep.subr.mxu1 %v1250_v6 }
 0x1f0   : > { %1307 = vmatpush2.msra.mxu1 %v1249_v7  ;;  %1472 = vmatmul.mubr.f32.gmra.mxu0 %v1793_v44  ;;  %v1358_v44 = vrot.slane %v1353_v61, %v2317_v41 }
 0x1f1   : > { %1308 = vmatprep.subr.mxu1 %v1248_v9 }
 0x1f2   : > { %1309 = vmatpush2.msra.mxu1 %v1247_v11 }
 0x1f3   : > { %1310 = vmatprep.subr.mxu1 %v1246_v12 }
 0x1f4   : > { %1311 = vmatpush2.msra.mxu1 %v1245_v13 }
 0x1f5   : > { %1312 = vmatprep.subr.mxu1 %v1244_v14 }
 0x1f6   : > { %1313 = vmatpush2.msra.mxu1 %v1243_v15  ;;  %v1482_v15 = vld [vmem:[#allocation14] sm:$0x3] }
 0x1f7   : > { %1314 = vmatprep.subr.mxu1 %v1242_v16 }
 0x1f8   : > { %1315 = vmatpush2.msra.mxu1 %v1241_v18 }
 0x1f9   : > { %1316 = vmatprep.subr.mxu1 %v1240_v19 }
 0x1fa   : > { %1317 = vmatpush2.msra.mxu1 %v1239_v0  ;;  %v1362_v0 = vrot.slane %v1353_v61, %v2319_v43 }
 0x1fb   : > { %1318 = vmatprep.subr.mxu1 %v1238_v20 }
 0x1fc   : > { %1319 = vmatpush2.msra.mxu1 %v1237_v21 }
 0x1fd   : > { %1320 = vmatprep.subr.mxu1 %v1236_v22 }
 0x1fe   : > { %1321 = vmatpush2.msra.mxu1 %v1235_v23 }
 0x1ff   : > { %1322 = vmatprep.subr.mxu1 %v1234_v24  ;;  %v1487_v24 = vrot.slane %v1482_v15, %v2317_v41 }
 0x200   : > { %1323 = vmatpush2.msra.mxu1 %v1233_v25 }
 0x201   : > { %1324 = vmatprep.subr.mxu1 %v1232_v26 }
 0x202   : > { %1325 = vmatpush2.msra.mxu1 %v1231_v27  ;;  %v1491_v27 = vrot.slane %v1482_v15, %v2319_v43 }
 0x203   : > { %1326 = vmatprep.subr.mxu1 %v1230_v28 }
 0x204   : > { %1327 = vmatpush2.msra.mxu1 %v1229_v29 }
 0x205   : > { %1328 = vmatprep.subr.mxu1 %v1228_v30 }
 0x206   : > { %1329 = vmatpush2.msra.mxu1 %v1227_v31 }
 0x207   : > { %1330 = vmatprep.subr.mxu1 %v1226_v32 }
 0x208   : > { %1331 = vmatpush2.msra.mxu1 %v1225_v33 }
 0x209   : > { %1332 = vmatprep.subr.mxu1 %v1224_v35 }
 0x20a   : > { %1333 = vmatpush2.msra.mxu1 %v1223_v37 }
 0x20b   : > { %1334 = vmatprep.subr.mxu1 %v1222_v38 }
 0x20c   : > { %1335 = vmatpush2.msra.mxu1 %v1221_v40 }
 0x20d   : > { %1337 = vmatmul.mubr.f32.vlgmr.msra.gmra.mxu1 %v1260_v48 }
 0x20e   : > { %1342 = vmatprep.mubr.f32.mxu1 %v1267_v50 }
 0x211   : > { %1343 = vmatmul.mubr.f32.gmra.mxu1 %v1265_v51 }
 0x244   : > { %v835_v52 = vpop.f32.mrf.mxu0 }
 0x246   : > { %v837_v54 = vpop.f32.mrf.mxu0 }
 0x248   : > { %v758_v53 = vpop.f32.mrf.mxu1 }
 0x249   : > { %v841_v55 = vpop.f32.mrf.mxu0  ;;  %v836_v63 = vadd.f32 %v835_v52, %v758_v53 }
 0x24a   : > { %v760_v17 = vpop.f32.mrf.mxu1 }
 0x24b   : > { %v843_v57 = vpop.f32.mrf.mxu0  ;;  %v838_v10 = vadd.f32 %v837_v54, %v760_v17 }
 0x24f   : > { %v764_v56 = vpop.f32.mrf.mxu1 }
 0x250   : > { %v842_v6 = vadd.f32 %v841_v55, %v764_v56 }
 0x251   : > { %v766_v58 = vpop.f32.mrf.mxu1 }
 0x252   : > { %v844_v11 = vadd.f32 %v843_v57, %v766_v58 }
 0x285   : > { %v1169_v59 = vpop.f32.mrf.mxu0 }
 0x287   : > { %v1171_v62 = vpop.f32.mrf.mxu0 }
 0x289   : > { %v1175_v2 = vpop.f32.mrf.mxu0 }
 0x28b   : > { %v1177_v5 = vpop.f32.mrf.mxu0 }
 0x28c   : > { %v1000_v60 = vpop.f32.mrf.mxu1 }
 0x28d   : > { %v1011_v4 = vadd.f32 %v1000_v60, %v836_v63 }
 0x28e   : > { %v1002_v1 = vpop.f32.mrf.mxu1 }
 0x28f   : > { %v1012_v7 = vadd.f32 %v1002_v1, %v838_v10  ;;  %v1180_v13 = vadd.f32 %v1169_v59, %v1011_v4 }
 0x291   : > { %v1006_v3 = vpop.f32.mrf.mxu1  ;;  %v1181_v19 = vadd.f32 %v1171_v62, %v1012_v7 }
 0x292   : > { %v1013_v12 = vadd.f32 %v1006_v3, %v842_v6 }
 0x293   : > { %v1008_v8 = vpop.f32.mrf.mxu1 }
 0x294   : > { %v1014_v16 = vadd.f32 %v1008_v8, %v844_v11  ;;  %v1182_v25 = vadd.f32 %v1175_v2, %v1013_v12 }
 0x296   : > { %v1183_v31 = vadd.f32 %v1177_v5, %v1014_v16 }
 0x2ac   : > { %v1467_v9 = vpop.f32.mrf.mxu0 }
 0x2ae   : > { %v1469_v21 = vpop.f32.mrf.mxu0 }
 0x2b0   : > { %v1473_v33 = vpop.f32.mrf.mxu0 }
 0x2b2   : > { %v1475_v43 = vpop.f32.mrf.mxu0 }
 0x2cd   : > { %v1338_v14 = vpop.f32.mrf.mxu1 }
 0x2ce   : > { %v1349_v18 = vadd.f32 %v1338_v14, %v1180_v13 }
 0x2cf   : > { %v1340_v20 = vpop.f32.mrf.mxu1 }
 0x2d0   : > { %v1350_v22 = vadd.f32 %v1340_v20, %v1181_v19  ;;  %v1365_v23 = vadd.f32 %v1358_v44, %v1349_v18 }
 0x2d1   : > { %v1344_v26 = vpop.f32.mrf.mxu1 }
 0x2d2   : > { %v1478_v28 = vadd.f32 %v1467_v9, %v1365_v23  ;;  %v1351_v29 = vadd.f32 %v1344_v26, %v1182_v25  ;;  %v1366_v30 = vadd.f32 %v1362_v0, %v1350_v22 }
 0x2d3   : > { %v1346_v32 = vpop.f32.mrf.mxu1 }
 0x2d4   : > { %v1494_v34 = vadd.f32 %v1487_v24, %v1478_v28  ;;  %v1479_v35 = vadd.f32 %v1469_v21, %v1366_v30  ;;  %v1352_v36 = vadd.f32 %v1346_v32, %v1183_v31  ;;  %v1367_v37 = vadd.f32 %v1358_v44, %v1351_v29 }
 0x2d6   : > { %v1498_v38 = vmax.f32 %v1494_v34, 0.0  ;;  %v1495_v39 = vadd.f32 %v1491_v27, %v1479_v35  ;;  %v1480_v40 = vadd.f32 %v1473_v33, %v1367_v37  ;;  %v1368_v41 = vadd.f32 %v1362_v0, %v1352_v36 }
 0x2d8   : > { %1502 = vst [vmem:[%s377_s18] sm:$0xff] %v1498_v38  ;;  %v1499_v42 = vmax.f32 %v1495_v39, 0.0  ;;  %v1496_v45 = vadd.f32 %v1487_v24, %v1480_v40  ;;  %v1481_v46 = vadd.f32 %v1475_v43, %v1368_v41 }
 0x2da   : > { %1503 = vst [vmem:[%s377_s18 + $0x8] sm:$0xff] %v1499_v42  ;;  %v1500_v47 = vmax.f32 %v1496_v45, 0.0  ;;  %v1497_v48 = vadd.f32 %v1491_v27, %v1481_v46 }
 0x2dc   : > { %1504 = vst [vmem:[%s377_s18 + $0x10] sm:$0xff] %v1500_v47  ;;  %v1501_v49 = vmax.f32 %v1497_v48, 0.0 }
 0x2de   : > { %1505 = vst [vmem:[%s377_s18 + $0x18] sm:$0xff] %v1501_v49 }
 0x2df   : > { %1992 = shalt.err (!%p1989_p6)
}
 0x2e0   : > { %s1993_s1 = scalar_lea.hbm %s2380_s15, 512  ;;  %s1997_s8 = scalar_lea.hbm %s2430_s7, 1024 }
 0x2e1   : > { %p1994_p5 = scmp.ne.s32.totalorder %s2380_s15, %s1993_s1  ;;  %p1998_p7 = scmp.lt.s32.totalorder %s2380_s15, %s2430_s7 }
 0x2e2   : > { %p1999_p10 = scmp.lt.s32.totalorder %s1997_s8, %s1993_s1 }
 0x2e3   : > { %p1995_p8 = pnand %p1994_p5, %p2454_p13 }
 0x2e4   : > { %p2000_p11 = por %p1999_p10, %p1998_p7 }
 0x2e5   : > { %p1996_p9 = pneg %p1995_p8 }
 0x2e7   : > { %p2001_p12 = pnand %p2000_p11, %p1996_p9 }
 0x2e9   : > { %2004 = shalt.err (!%p2001_p12)
}
 0x2ea   : > { %s2070_s14 = smov 256   ;;  %s2071_s9 = smov 16  }
 0x2eb   : > { %1704 = dma.vmem_to_hbm [thread:$0]  (%p2454_p13), %s2375_s23, 512, %s2380_s15, %s1507_s19, %s2070_s14, %s2070_s14, %s2071_s9  }
 0x2ec PF: > { %s1535_s17 = sand.u32 1, %s2043_s24   ;;  %p2455_p0 = scmp.ne.s32.totalorder %s2444_s13, 0 }
 0x2ed   : > { %p2456_p2 = scmp.ge.s32.totalorder %s2055_s27, 2  ;;  %s1536_s30 = scalar_lea.sflag [#allocation5], %s1535_s17 }
 0x2ef   : > { %p1730_p1 = pnand %p2456_p2, %p2455_p0 }
 0x2f1   : > { %p1731_p4 = pneg %p1730_p1 }
 0x2f3   : > { %2038 = dma.done.wait (%p1731_p4), %s1536_s30, 512  }
 0x2f4   : > { %2040 = vsyncadd (%p1731_p4), %s1536_s30, 4294966784  ;;  %p23_p3 = scmp.ge.s32.totalorder %s2215_s11, 4   ;;  %s2457_s24 = smov %s2047_s25 }
 0x2f5   : > { %s2458_s25 = smov %s2051_s26  ;;  %s2459_s26 = smov %s2226_s12 }
 0x2f6   : > { %s2460_s27 = smov %s2215_s11  ;;  %25 = sbr.rel (!%p23_p3) target bundleno = 10 (0xa), region = 121 }
 0x2fb   :  { %1541 = vsyncpa [#allocation4], 1 }
 0x2fc   :  { %1543 = vsyncpa [#allocation4 + $0x1], 1 }
 0x2fd   :  { %1544 = vsyncpa [#allocation7], 1 }
 0x2fe   :  { %1545 = vsyncpa [#allocation10], 1 }
 0x2ff   :  { %1546 = vsyncpa [#allocation13], 1 }
 0x300   :  { %1547 = vsyncpa [#allocation5], 1 }
 0x301   :  { %1549 = vsyncpa [#allocation5 + $0x1], 1 }

</bundles_post_ra>
